<compile_context>
chip_gen: v7x
topology: tpu7x:2x2x1
jax: 0.10.0
libtpu: 0.0.40
codegen_flags: <defaults>
</compile_context>

<pallas_src>
import jax
import jax.numpy as jnp
from jax.experimental import pallas as pl
from jax.experimental.pallas import tpu as pltpu

# Logical layer sizes of the PyTorch module Net.
SIZES = [784, 512, 256, 128, 64, 32, 10]
# Lane-padded sizes (multiples of 128) actually used inside the kernel.
PAD_SIZES = [896, 512, 256, 128, 128, 128, 128]

NUM_CLASSES = SIZES[-1]          # 10 real classes
OUT_PAD = PAD_SIZES[-1]          # 128-wide output slab
MAX_TILE_B = 512                 # batch rows per grid step for large batches
BIAS_ROWS = 8                    # packed-bias buffer rows (sublane aligned, 6 used)
BIAS_COLS = max(PAD_SIZES[1:])   # 512


def _mlp_kernel(x_ref, w1, w2, w3, w4, w5, w6, b_ref, out_ref):
    """One batch tile through the whole MLP: 5x (matmul+bias+relu),
    final matmul+bias, mask padded classes, then log_softmax."""
    weights = (w1, w2, w3, w4, w5, w6)

    h = x_ref[...]                                      # (TILE_B, 896) bf16
    for layer in range(5):                              # fc1..fc5 + relu (unrolled)
        out_dim = PAD_SIZES[layer + 1]
        acc = jnp.dot(h, weights[layer][...],
                      preferred_element_type=jnp.float32)
        bias = b_ref[layer:layer + 1, :out_dim]         # (1, out_dim) f32, static slice
        # bias-add + relu in f32, single downcast (pack) per layer.
        h = jnp.maximum(acc + bias, 0.0).astype(jnp.bfloat16)

    # fc6 (logits), f32.
    acc = jnp.dot(h, weights[5][...], preferred_element_type=jnp.float32)
    logits = acc + b_ref[5:6, :OUT_PAD]                 # (TILE_B, 128)

    # Padded class columns (>= 10) must not perturb log_softmax.
    col = jax.lax.broadcasted_iota(jnp.int32, logits.shape, 1)
    logits = jnp.where(col < NUM_CLASSES, logits, jnp.float32(-1e30))

    # log_softmax(dim=1), numerically stable, in f32.
    m = jnp.max(logits, axis=-1, keepdims=True)
    z = logits - m
    lse = jnp.log(jnp.sum(jnp.exp(z), axis=-1, keepdims=True))
    out_ref[...] = (z - lse).astype(out_ref.dtype)      # lane-dense (TILE_B, 128) store


def init_params(key):
    """Deterministic parameter init mimicking PyTorch Linear defaults
    (uniform in +-1/sqrt(fan_in)).  Weights stored as (in, out) f32."""
    params = []
    for i in range(len(SIZES) - 1):
        fan_in, fan_out = SIZES[i], SIZES[i + 1]
        key, kw, kb = jax.random.split(key, 3)
        bound = 1.0 / jnp.sqrt(jnp.float32(fan_in))
        w = jax.random.uniform(kw, (fan_in, fan_out), jnp.float32, -bound, bound)
        b = jax.random.uniform(kb, (fan_out,), jnp.float32, -bound, bound)
        params.append((w, b))
    return params


def _pick_tile_b(batch):
    """Choose a batch tile size: big tiles for large batches, and >=2 tiles
    whenever the batch allows it (keeps both v7x TensorCores busy)."""
    if batch > MAX_TILE_B:
        return MAX_TILE_B                                   # >= 2 tiles of 512
    if batch >= 256:
        half = pl.cdiv(batch, 2)                            # split into 2 tiles
        return ((half + 127) // 128) * 128
    # Small batch: a single tile, rows rounded up to the 8-sublane granule.
    return max(8, ((batch + 7) // 8) * 8)


def _pad2d(w, rows, cols):
    r, c = w.shape
    return jnp.pad(w, ((0, rows - r), (0, cols - c)))


def net_forward(x, params):
    """x: (B, 1, 28, 28) or anything flattenable to (-1, 784). Returns (B, 10)."""
    x2d = x.astype(jnp.float32).reshape(-1, SIZES[0])        # x.view(-1, 784)
    batch = x2d.shape[0]

    tile_b = _pick_tile_b(batch)
    n_tiles = pl.cdiv(batch, tile_b)
    b_pad = n_tiles * tile_b

    # Pad batch rows (dropped at the end) and feature lanes 784 -> 896 (zeros).
    x_p = jnp.pad(x2d, ((0, b_pad - batch), (0, PAD_SIZES[0] - SIZES[0])))
    x_bf16 = x_p.astype(jnp.bfloat16)

    # Lane-padded bf16 weights (zero rows/cols keep the math exact);
    # biases packed into one lane-dense f32 buffer (padded bias entries are 0).
    ws = [_pad2d(w, PAD_SIZES[i], PAD_SIZES[i + 1]).astype(jnp.bfloat16)
          for i, (w, _) in enumerate(params)]
    bias_pack = jnp.zeros((BIAS_ROWS, BIAS_COLS), jnp.float32)
    for i, (_, b) in enumerate(params):
        bias_pack = bias_pack.at[i, :b.shape[-1]].set(b)

    in_specs = [pl.BlockSpec((tile_b, PAD_SIZES[0]), lambda i: (i, 0))]  # activations: tiled
    for w in ws:                                                         # weights: resident
        in_specs.append(pl.BlockSpec(w.shape, lambda i: (0, 0)))
    in_specs.append(pl.BlockSpec(bias_pack.shape, lambda i: (0, 0)))     # biases: resident

    flops = 2 * b_pad * sum(PAD_SIZES[i] * PAD_SIZES[i + 1] for i in range(6))
    bytes_accessed = (x_bf16.size * 2 + sum(int(w.size) for w in ws) * 2
                      + bias_pack.size * 4 + b_pad * OUT_PAD * 4)
    cost = pl.CostEstimate(flops=flops,
                           transcendentals=b_pad * OUT_PAD,      # exp in log_softmax
                           bytes_accessed=bytes_accessed)

    out = pl.pallas_call(
        _mlp_kernel,
        out_shape=jax.ShapeDtypeStruct((b_pad, OUT_PAD), jnp.float32),
        grid=(n_tiles,),
        in_specs=in_specs,
        out_specs=pl.BlockSpec((tile_b, OUT_PAD), lambda i: (i, 0)),
        compiler_params=pltpu.CompilerParams(
            dimension_semantics=("parallel",),
            vmem_limit_bytes=32 << 20),
        cost_estimate=cost,
    )(x_bf16, *ws, bias_pack)

    return out[:batch, :NUM_CLASSES]


if __name__ == "__main__":
    key = jax.random.PRNGKey(0)
    key, kx = jax.random.split(key)

    # Small batch of fake Fashion-MNIST images, NCHW like the PyTorch model.
    x = jax.random.normal(kx, (8, 1, 28, 28), dtype=jnp.float32)

    params = init_params(key)
    out = net_forward(x, params)
    out = jax.block_until_ready(out)

    assert out.shape == (8, 10)
    assert bool(jnp.all(jnp.isfinite(out)))
    # log_softmax rows should (approximately) sum to probability 1.
    assert bool(jnp.allclose(jnp.sum(jnp.exp(out), axis=1), 1.0, atol=1e-4))

    print("KERNEL_OK")
</pallas_src>

<mosaic_0001>
module attributes {stable_mosaic.version = 11 : i64} {
  func.func @_mlp_kernel(%arg0: i32, %arg1: memref<8x896xbf16, #tpu.memory_space<vmem>>, %arg2: memref<896x512xbf16, #tpu.memory_space<vmem>>, %arg3: memref<512x256xbf16, #tpu.memory_space<vmem>>, %arg4: memref<256x128xbf16, #tpu.memory_space<vmem>>, %arg5: memref<128x128xbf16, #tpu.memory_space<vmem>>, %arg6: memref<128x128xbf16, #tpu.memory_space<vmem>>, %arg7: memref<128x128xbf16, #tpu.memory_space<vmem>>, %arg8: memref<8x512xf32, #tpu.memory_space<vmem>>, %arg9: memref<8x128xf32, #tpu.memory_space<vmem>>) attributes {dimension_semantics = [#tpu.dimension_semantics<parallel>], iteration_bounds = array<i64: 1>, scalar_prefetch = 0 : i64, scratch_operands = 0 : i64, tpu.core_type = #tpu.core_type<tc>, window_params = [{transform_indices = @transform_0, window_bounds = array<i64: 8, 896>}, {pipeline_mode = #tpu.pipeline_mode<synchronous>, transform_indices = @transform_1, window_bounds = array<i64: 896, 512>}, {pipeline_mode = #tpu.pipeline_mode<synchronous>, transform_indices = @transform_2, window_bounds = array<i64: 512, 256>}, {pipeline_mode = #tpu.pipeline_mode<synchronous>, transform_indices = @transform_3, window_bounds = array<i64: 256, 128>}, {pipeline_mode = #tpu.pipeline_mode<synchronous>, transform_indices = @transform_4, window_bounds = array<i64: 128, 128>}, {pipeline_mode = #tpu.pipeline_mode<synchronous>, transform_indices = @transform_5, window_bounds = array<i64: 128, 128>}, {pipeline_mode = #tpu.pipeline_mode<synchronous>, transform_indices = @transform_6, window_bounds = array<i64: 128, 128>}, {pipeline_mode = #tpu.pipeline_mode<synchronous>, transform_indices = @transform_7, window_bounds = array<i64: 8, 512>}, {transform_indices = @transform_8, window_bounds = array<i64: 8, 128>}]} {
    %c0 = arith.constant 0 : index
    %c0_0 = arith.constant 0 : index
    %0 = vector.load %arg1[%c0, %c0_0] : memref<8x896xbf16, #tpu.memory_space<vmem>>, vector<8x896xbf16>
    %c0_1 = arith.constant 0 : index
    %c0_2 = arith.constant 0 : index
    %1 = vector.load %arg2[%c0_1, %c0_2] : memref<896x512xbf16, #tpu.memory_space<vmem>>, vector<896x512xbf16>
    %cst = arith.constant dense<0.000000e+00> : vector<8x512xf32>
    %2 = tpu.matmul %0, %1, %cst {dimension_numbers = #tpu.dot_dimension_numbers<[1], [0], [0], [1], [0, 0, 1, 1], [], []>} : vector<8x896xbf16>, vector<896x512xbf16>, vector<8x512xf32> -> vector<8x512xf32>
    %c0_3 = arith.constant 0 : index
    %c0_4 = arith.constant 0 : index
    %3 = vector.load %arg8[%c0_3, %c0_4] : memref<8x512xf32, #tpu.memory_space<vmem>>, vector<1x512xf32>
    %4 = vector.broadcast %3 : vector<1x512xf32> to vector<8x512xf32>
    %5 = arith.addf %2, %4 : vector<8x512xf32>
    %cst_5 = arith.constant 0.000000e+00 : f32
    %6 = vector.broadcast %cst_5 : f32 to vector<8x512xf32>
    %7 = arith.maximumf %5, %6 : vector<8x512xf32>
    %8 = arith.truncf %7 : vector<8x512xf32> to vector<8x512xbf16>
    %c0_6 = arith.constant 0 : index
    %c0_7 = arith.constant 0 : index
    %9 = vector.load %arg3[%c0_6, %c0_7] : memref<512x256xbf16, #tpu.memory_space<vmem>>, vector<512x256xbf16>
    %cst_8 = arith.constant dense<0.000000e+00> : vector<8x256xf32>
    %10 = tpu.matmul %8, %9, %cst_8 {dimension_numbers = #tpu.dot_dimension_numbers<[1], [0], [0], [1], [0, 0, 1, 1], [], []>} : vector<8x512xbf16>, vector<512x256xbf16>, vector<8x256xf32> -> vector<8x256xf32>
    %c1 = arith.constant 1 : index
    %c0_9 = arith.constant 0 : index
    %11 = vector.load %arg8[%c1, %c0_9] : memref<8x512xf32, #tpu.memory_space<vmem>>, vector<1x256xf32>
    %12 = vector.broadcast %11 : vector<1x256xf32> to vector<8x256xf32>
    %13 = arith.addf %10, %12 : vector<8x256xf32>
    %cst_10 = arith.constant 0.000000e+00 : f32
    %14 = vector.broadcast %cst_10 : f32 to vector<8x256xf32>
    %15 = arith.maximumf %13, %14 : vector<8x256xf32>
    %16 = arith.truncf %15 : vector<8x256xf32> to vector<8x256xbf16>
    %c0_11 = arith.constant 0 : index
    %c0_12 = arith.constant 0 : index
    %17 = vector.load %arg4[%c0_11, %c0_12] : memref<256x128xbf16, #tpu.memory_space<vmem>>, vector<256x128xbf16>
    %cst_13 = arith.constant dense<0.000000e+00> : vector<8x128xf32>
    %18 = tpu.matmul %16, %17, %cst_13 {dimension_numbers = #tpu.dot_dimension_numbers<[1], [0], [0], [1], [0, 0, 1, 1], [], []>} : vector<8x256xbf16>, vector<256x128xbf16>, vector<8x128xf32> -> vector<8x128xf32>
    %c2 = arith.constant 2 : index
    %c0_14 = arith.constant 0 : index
    %19 = vector.load %arg8[%c2, %c0_14] : memref<8x512xf32, #tpu.memory_space<vmem>>, vector<1x128xf32>
    %20 = vector.broadcast %19 : vector<1x128xf32> to vector<8x128xf32>
    %21 = arith.addf %18, %20 : vector<8x128xf32>
    %cst_15 = arith.constant 0.000000e+00 : f32
    %22 = vector.broadcast %cst_15 : f32 to vector<8x128xf32>
    %23 = arith.maximumf %21, %22 : vector<8x128xf32>
    %24 = arith.truncf %23 : vector<8x128xf32> to vector<8x128xbf16>
    %c0_16 = arith.constant 0 : index
    %c0_17 = arith.constant 0 : index
    %25 = vector.load %arg5[%c0_16, %c0_17] : memref<128x128xbf16, #tpu.memory_space<vmem>>, vector<128x128xbf16>
    %cst_18 = arith.constant dense<0.000000e+00> : vector<8x128xf32>
    %26 = tpu.matmul %24, %25, %cst_18 {dimension_numbers = #tpu.dot_dimension_numbers<[1], [0], [0], [1], [0, 0, 1, 1], [], []>} : vector<8x128xbf16>, vector<128x128xbf16>, vector<8x128xf32> -> vector<8x128xf32>
    %c3 = arith.constant 3 : index
    %c0_19 = arith.constant 0 : index
    %27 = vector.load %arg8[%c3, %c0_19] : memref<8x512xf32, #tpu.memory_space<vmem>>, vector<1x128xf32>
    %28 = vector.broadcast %27 : vector<1x128xf32> to vector<8x128xf32>
    %29 = arith.addf %26, %28 : vector<8x128xf32>
    %cst_20 = arith.constant 0.000000e+00 : f32
    %30 = vector.broadcast %cst_20 : f32 to vector<8x128xf32>
    %31 = arith.maximumf %29, %30 : vector<8x128xf32>
    %32 = arith.truncf %31 : vector<8x128xf32> to vector<8x128xbf16>
    %c0_21 = arith.constant 0 : index
    %c0_22 = arith.constant 0 : index
    %33 = vector.load %arg6[%c0_21, %c0_22] : memref<128x128xbf16, #tpu.memory_space<vmem>>, vector<128x128xbf16>
    %cst_23 = arith.constant dense<0.000000e+00> : vector<8x128xf32>
    %34 = tpu.matmul %32, %33, %cst_23 {dimension_numbers = #tpu.dot_dimension_numbers<[1], [0], [0], [1], [0, 0, 1, 1], [], []>} : vector<8x128xbf16>, vector<128x128xbf16>, vector<8x128xf32> -> vector<8x128xf32>
    %c4 = arith.constant 4 : index
    %c0_24 = arith.constant 0 : index
    %35 = vector.load %arg8[%c4, %c0_24] : memref<8x512xf32, #tpu.memory_space<vmem>>, vector<1x128xf32>
    %36 = vector.broadcast %35 : vector<1x128xf32> to vector<8x128xf32>
    %37 = arith.addf %34, %36 : vector<8x128xf32>
    %cst_25 = arith.constant 0.000000e+00 : f32
    %38 = vector.broadcast %cst_25 : f32 to vector<8x128xf32>
    %39 = arith.maximumf %37, %38 : vector<8x128xf32>
    %40 = arith.truncf %39 : vector<8x128xf32> to vector<8x128xbf16>
    %c0_26 = arith.constant 0 : index
    %c0_27 = arith.constant 0 : index
    %41 = vector.load %arg7[%c0_26, %c0_27] : memref<128x128xbf16, #tpu.memory_space<vmem>>, vector<128x128xbf16>
    %cst_28 = arith.constant dense<0.000000e+00> : vector<8x128xf32>
    %42 = tpu.matmul %40, %41, %cst_28 {dimension_numbers = #tpu.dot_dimension_numbers<[1], [0], [0], [1], [0, 0, 1, 1], [], []>} : vector<8x128xbf16>, vector<128x128xbf16>, vector<8x128xf32> -> vector<8x128xf32>
    %c5 = arith.constant 5 : index
    %c0_29 = arith.constant 0 : index
    %43 = vector.load %arg8[%c5, %c0_29] : memref<8x512xf32, #tpu.memory_space<vmem>>, vector<1x128xf32>
    %44 = vector.broadcast %43 : vector<1x128xf32> to vector<8x128xf32>
    %45 = arith.addf %42, %44 : vector<8x128xf32>
    %46 = tpu.iota {dimensions = array<i32: 1>} : vector<8x128xi32>
    %c10_i32 = arith.constant 10 : i32
    %47 = vector.broadcast %c10_i32 : i32 to vector<8x128xi32>
    %48 = arith.cmpi slt, %46, %47 : vector<8x128xi32>
    %cst_30 = arith.constant -1.000000e+30 : f32
    %49 = vector.broadcast %cst_30 : f32 to vector<8x128xf32>
    %50 = arith.select %48, %45, %49 : vector<8x128xi1>, vector<8x128xf32>
    %cst_31 = arith.constant dense<0xFF800000> : vector<8xf32>
    %51 = vector.multi_reduction <maximumf>, %50, %cst_31 [1] : vector<8x128xf32> to vector<8xf32>
    %52 = vector.shape_cast %51 : vector<8xf32> to vector<8x1xf32>
    %53 = vector.broadcast %52 : vector<8x1xf32> to vector<8x128xf32>
    %54 = arith.subf %50, %53 : vector<8x128xf32>
    %55 = math.exp %54 : vector<8x128xf32>
    %cst_32 = arith.constant dense<0.000000e+00> : vector<8xf32>
    %56 = vector.multi_reduction <add>, %55, %cst_32 [1] : vector<8x128xf32> to vector<8xf32>
    %57 = vector.shape_cast %56 : vector<8xf32> to vector<8x1xf32>
    %58 = math.log %57 : vector<8x1xf32>
    %59 = vector.broadcast %58 : vector<8x1xf32> to vector<8x128xf32>
    %60 = arith.subf %54, %59 : vector<8x128xf32>
    %c0_33 = arith.constant 0 : index
    %c0_34 = arith.constant 0 : index
    %61 = vector.load %arg9[%c0_33, %c0_34] : memref<8x128xf32, #tpu.memory_space<vmem>>, vector<8x128xf32>
    tpu.vector_store %arg9[%c0_33, %c0_34], %60 {strides = array<i32>} : memref<8x128xf32, #tpu.memory_space<vmem>>, vector<8x128xf32>,
    return
  }
  func.func @transform_0(%arg0: i32) -> (i32, i32) {
    %c0_i32 = arith.constant 0 : i32
    %c0_i32_0 = arith.constant 0 : i32
    return %arg0, %c0_i32 : i32, i32
  }
  func.func @transform_1(%arg0: i32) -> (i32, i32) {
    %c0_i32 = arith.constant 0 : i32
    %c0_i32_0 = arith.constant 0 : i32
    %c0_i32_1 = arith.constant 0 : i32
    return %c0_i32, %c0_i32_0 : i32, i32
  }
  func.func @transform_2(%arg0: i32) -> (i32, i32) {
    %c0_i32 = arith.constant 0 : i32
    %c0_i32_0 = arith.constant 0 : i32
    %c0_i32_1 = arith.constant 0 : i32
    return %c0_i32, %c0_i32_0 : i32, i32
  }
  func.func @transform_3(%arg0: i32) -> (i32, i32) {
    %c0_i32 = arith.constant 0 : i32
    %c0_i32_0 = arith.constant 0 : i32
    %c0_i32_1 = arith.constant 0 : i32
    return %c0_i32, %c0_i32_0 : i32, i32
  }
  func.func @transform_4(%arg0: i32) -> (i32, i32) {
    %c0_i32 = arith.constant 0 : i32
    %c0_i32_0 = arith.constant 0 : i32
    %c0_i32_1 = arith.constant 0 : i32
    return %c0_i32, %c0_i32_0 : i32, i32
  }
  func.func @transform_5(%arg0: i32) -> (i32, i32) {
    %c0_i32 = arith.constant 0 : i32
    %c0_i32_0 = arith.constant 0 : i32
    %c0_i32_1 = arith.constant 0 : i32
    return %c0_i32, %c0_i32_0 : i32, i32
  }
  func.func @transform_6(%arg0: i32) -> (i32, i32) {
    %c0_i32 = arith.constant 0 : i32
    %c0_i32_0 = arith.constant 0 : i32
    %c0_i32_1 = arith.constant 0 : i32
    return %c0_i32, %c0_i32_0 : i32, i32
  }
  func.func @transform_7(%arg0: i32) -> (i32, i32) {
    %c0_i32 = arith.constant 0 : i32
    %c0_i32_0 = arith.constant 0 : i32
    %c0_i32_1 = arith.constant 0 : i32
    return %c0_i32, %c0_i32_0 : i32, i32
  }
  func.func @transform_8(%arg0: i32) -> (i32, i32) {
    %c0_i32 = arith.constant 0 : i32
    %c0_i32_0 = arith.constant 0 : i32
    return %arg0, %c0_i32 : i32, i32
  }
}

</mosaic_0001>

<bundles_post_ra>
// kernel: tpu_custom_call.1
= control target key start
LH: loop header
LB: loop body
LE: loop exit
PB: predicated region body
PF: predicated region fallthrough
CT: control target
= control target key end

     0   :  { %13 = vsyncpa [#allocation3], 0  ;;  %s4313_s0 = inlined_call_operand.hbm [shape: bf16[8,896], index: 0, kind: input, shape index: {}]   ;;  %s4314_s1 = inlined_call_operand.hbm [shape: bf16[896,512], index: 1, kind: input, shape index: {}]   ;;  %s4315_s2 = inlined_call_operand.hbm [shape: bf16[512,256], index: 2, kind: input, shape index: {}]   ;;  %s4316_s3 = inlined_call_operand.hbm [shape: bf16[256,128], index: 3, kind: input, shape index: {}]   ;;  %s4317_s4 = inlined_call_operand.hbm [shape: bf16[128,128], index: 4, kind: input, shape index: {}]   ;;  %s4318_s5 = inlined_call_operand.hbm [shape: bf16[128,128], index: 5, kind: input, shape index: {}]   ;;  %s4319_s6 = inlined_call_operand.hbm [shape: bf16[128,128], index: 6, kind: input, shape index: {}]   ;;  %s4320_s7 = inlined_call_operand.hbm [shape: f32[8,512], index: 7, kind: input, shape index: {}]   ;;  %s4321_s8 = inlined_call_operand.hbm [shape: f32[8,128], index: 8, kind: output, shape index: {}]  }
   0x1   :  { %14 = vsyncpa [#allocation6], 0 }
   0x2   :  { %15 = vsyncpa [#allocation9], 0 }
   0x3   :  { %16 = vsyncpa [#allocation12], 0 }
   0x4   :  { %17 = vsyncpa [#allocation15], 0 }
   0x5   :  { %18 = vsyncpa [#allocation4], 0  ;;  %s4063_s27 = smov [#allocation5]   ;;  %s3853_s9 = scalar_lea.hbm %s4314_s1, 28672 }
   0x6   :  { %s34_s28 = sshll.u32 %s4063_s27, 4  ;;  %p3854_p0 = scmp.ne.s32.totalorder %s4314_s1, %s3853_s9  ;;  %s35_s28 = int_to_ptr.vmem [resolvable:$true] %s34_s28 }
   0x7   :  { %p3857_p1 = scmp.lt.u32.totalorder %s3853_s9, %s4314_s1 }
   0x9   :  { %p3859_p2 = pnand %p3857_p1, %p3854_p0 }
   0xb   :  { %3862 = shalt.err (!%p3859_p2)
}
   0xc   :  { %s3863_s14 = scalar_lea.vmem %s35_s28, 28672  ;;  %p3868_p4 = scmp.lt.s32.totalorder %s35_s28, %s35_s28 }
   0xd   :  { %p3864_p3 = scmp.ne.s32.totalorder %s35_s28, %s3863_s14  ;;  %p3869_p5 = scmp.lt.s32.totalorder %s3863_s14, %s3863_s14 }
   0xf   :  { %p3870_p6 = por %p3869_p5, %p3868_p4 }
  0x11   :  { %p3871_p7 = pnand %p3870_p6, %p3864_p3 }
  0x13   :  { %3874 = shalt.err (!%p3871_p7)
}
  0x14   :  { %s4064_s15 = smov 256   ;;  %s4065_s16 = smov 16  }
  0x15   :  { %40 = dma.hbm_to_vmem [thread:$0]  %s4314_s1, 28672, %s35_s28, [#allocation6], %s4064_s15, %s4064_s15, %s4065_s16  }
  0x16   :  { %s4066_s19 = smov [#allocation8]   ;;  %s3875_s23 = scalar_lea.hbm %s4316_s3, 2048 }
  0x17   :  { %s58_s20 = sshll.u32 %s4066_s19, 4  ;;  %p3876_p8 = scmp.ne.s32.totalorder %s4316_s3, %s3875_s23  ;;  %s59_s20 = int_to_ptr.vmem [resolvable:$true] %s58_s20 }
  0x18   :  { %p3879_p9 = scmp.lt.u32.totalorder %s3875_s23, %s4316_s3 }
  0x1a   :  { %p3881_p10 = pnand %p3879_p9, %p3876_p8 }
  0x1c   :  { %3884 = shalt.err (!%p3881_p10)
}
  0x1d   :  { %s3885_s29 = scalar_lea.vmem %s59_s20, 2048  ;;  %p3890_p12 = scmp.lt.s32.totalorder %s59_s20, %s59_s20 }
  0x1e   :  { %p3886_p11 = scmp.ne.s32.totalorder %s59_s20, %s3885_s29  ;;  %p3891_p13 = scmp.lt.s32.totalorder %s3885_s29, %s3885_s29 }
  0x20   :  { %p3892_p0 = por %p3891_p13, %p3890_p12 }
  0x22   :  { %p3893_p1 = pnand %p3892_p0, %p3886_p11 }
  0x24   :  { %3896 = shalt.err (!%p3893_p1)
}
  0x25   :  { %s4067_s1 = smov 64   ;;  %s4068_s28 = smov 4  }
  0x26   :  { %64 = dma.hbm_to_vmem [thread:$0]  %s4316_s3, 2048, %s59_s20, [#allocation9], %s4067_s1, %s4067_s1, %s4068_s28  }
  0x27   :  { %s4069_s10 = smov [#allocation11]   ;;  %s4070_s12 = smov [#allocation2]  }
  0x28   :  { %s82_s11 = sshll.u32 %s4069_s10, 4  ;;  %s25_s13 = sshll.u32 %s4070_s12, 4  ;;  %s83_s11 = int_to_ptr.vmem [resolvable:$true] %s82_s11  ;;  %s26_s13 = int_to_ptr.vmem [resolvable:$true] %s25_s13 }
  0x29   :  { %s3897_s16 = scalar_lea.hbm %s4318_s5, 1024 }
  0x2a   :  { %p3898_p2 = scmp.ne.s32.totalorder %s4318_s5, %s3897_s16  ;;  %p3901_p3 = scmp.lt.u32.totalorder %s3897_s16, %s4318_s5 }
  0x2c   :  { %p3903_p4 = pnand %p3901_p3, %p3898_p2 }
  0x2e   :  { %3906 = shalt.err (!%p3903_p4)
}
  0x2f   :  { %s3907_s3 = scalar_lea.vmem %s83_s11, 1024  ;;  %p3912_p6 = scmp.lt.s32.totalorder %s83_s11, %s83_s11 }
  0x30   :  { %p3908_p5 = scmp.ne.s32.totalorder %s83_s11, %s3907_s3  ;;  %p3913_p7 = scmp.lt.s32.totalorder %s3907_s3, %s3907_s3 }
  0x32   :  { %p3914_p8 = por %p3913_p7, %p3912_p6 }
  0x34   :  { %p3915_p9 = pnand %p3914_p8, %p3908_p5 }
  0x36   :  { %3918 = shalt.err (!%p3915_p9)
}
  0x37   :  { %88 = dma.hbm_to_vmem [thread:$0]  %s4318_s5, 1024, %s83_s11, [#allocation12], %s4067_s1, %s4067_s1, %s4068_s28  }
  0x38   :  { %s3919_s25 = scalar_lea.hbm %s4313_s0, 448 }
  0x39   :  { %p3920_p10 = scmp.ne.s32.totalorder %s4313_s0, %s3919_s25  ;;  %p3923_p11 = scmp.lt.u32.totalorder %s3919_s25, %s4313_s0 }
  0x3b   :  { %p3925_p12 = pnand %p3923_p11, %p3920_p10 }
  0x3d   :  { %3928 = shalt.err (!%p3925_p12)
}
  0x3e   :  { %s3929_s9 = scalar_lea.vmem %s26_s13, 448  ;;  %p3934_p0 = scmp.lt.s32.totalorder %s26_s13, %s26_s13 }
  0x3f   :  { %p3930_p13 = scmp.ne.s32.totalorder %s26_s13, %s3929_s9  ;;  %p3935_p1 = scmp.lt.s32.totalorder %s3929_s9, %s3929_s9 }
  0x41   :  { %p3936_p2 = por %p3935_p1, %p3934_p0 }
  0x43   :  { %p3937_p3 = pnand %p3936_p2, %p3930_p13 }
  0x45   :  { %3940 = shalt.err (!%p3937_p3)
}
  0x46   :  { %28 = dma.hbm_to_vmem [thread:$0]  %s4313_s0, 448, %s26_s13, [#allocation3]  }
  0x47   :  { %s4071_s11 = smov [#allocation7]   ;;  %s3941_s16 = scalar_lea.hbm %s4315_s2, 8192 }
  0x48   :  { %s46_s12 = sshll.u32 %s4071_s11, 4  ;;  %p3942_p4 = scmp.ne.s32.totalorder %s4315_s2, %s3941_s16  ;;  %s47_s12 = int_to_ptr.vmem [resolvable:$true] %s46_s12 }
  0x49   :  { %p3945_p5 = scmp.lt.u32.totalorder %s3941_s16, %s4315_s2 }
  0x4b   :  { %p3947_p6 = pnand %p3945_p5, %p3942_p4 }
  0x4d   :  { %3950 = shalt.err (!%p3947_p6)
}
  0x4e   :  { %s3951_s3 = scalar_lea.vmem %s47_s12, 8192  ;;  %p3956_p8 = scmp.lt.s32.totalorder %s47_s12, %s47_s12 }
  0x4f   :  { %p3952_p7 = scmp.ne.s32.totalorder %s47_s12, %s3951_s3  ;;  %p3957_p9 = scmp.lt.s32.totalorder %s3951_s3, %s3951_s3 }
  0x51   :  { %p3958_p10 = por %p3957_p9, %p3956_p8 }
  0x53   :  { %p3959_p11 = pnand %p3958_p10, %p3952_p7 }
  0x55   :  { %3962 = shalt.err (!%p3959_p11)
}
  0x56   :  { %s4072_s0 = smov 128   ;;  %s4073_s13 = smov 8  }
  0x57   :  { %52 = dma.hbm_to_vmem [thread:$0]  %s4315_s2, 8192, %s47_s12, [#allocation6], %s4072_s0, %s4072_s0, %s4073_s13  }
  0x58   :  { %s4074_s23 = smov [#allocation10]   ;;  %s4075_s25 = smov [#allocation13]  }
  0x59   :  { %s70_s24 = sshll.u32 %s4074_s23, 4  ;;  %s94_s26 = sshll.u32 %s4075_s25, 4  ;;  %s71_s24 = int_to_ptr.vmem [resolvable:$true] %s70_s24  ;;  %s95_s26 = int_to_ptr.vmem [resolvable:$true] %s94_s26 }
  0x5a   :  { %s3963_s30 = scalar_lea.hbm %s4317_s4, 1024 }
  0x5b   :  { %p3964_p12 = scmp.ne.s32.totalorder %s4317_s4, %s3963_s30  ;;  %p3967_p13 = scmp.lt.u32.totalorder %s3963_s30, %s4317_s4 }
  0x5d   :  { %p3969_p0 = pnand %p3967_p13, %p3964_p12 }
  0x5f   :  { %3972 = shalt.err (!%p3969_p0)
}
  0x60   :  { %s3973_s2 = scalar_lea.vmem %s71_s24, 1024  ;;  %p3978_p2 = scmp.lt.s32.totalorder %s71_s24, %s71_s24 }
  0x61   :  { %p3974_p1 = scmp.ne.s32.totalorder %s71_s24, %s3973_s2  ;;  %p3979_p3 = scmp.lt.s32.totalorder %s3973_s2, %s3973_s2 }
  0x63   :  { %p3980_p4 = por %p3979_p3, %p3978_p2 }
  0x65   :  { %p3981_p5 = pnand %p3980_p4, %p3974_p1 }
  0x67   :  { %3984 = shalt.err (!%p3981_p5)
}
  0x68   :  { %76 = dma.hbm_to_vmem [thread:$0]  %s4317_s4, 1024, %s71_s24, [#allocation9], %s4067_s1, %s4067_s1, %s4068_s28  }
  0x69   :  { %s3985_s17 = scalar_lea.hbm %s4319_s6, 1024 }
  0x6a   :  { %p3986_p6 = scmp.ne.s32.totalorder %s4319_s6, %s3985_s17  ;;  %p3989_p7 = scmp.lt.u32.totalorder %s3985_s17, %s4319_s6 }
  0x6c   :  { %p3991_p8 = pnand %p3989_p7, %p3986_p6 }
  0x6e   :  { %3994 = shalt.err (!%p3991_p8)
}
  0x6f   :  { %s3995_s0 = scalar_lea.vmem %s95_s26, 1024  ;;  %p4000_p10 = scmp.lt.s32.totalorder %s95_s26, %s95_s26 }
  0x70   :  { %p3996_p9 = scmp.ne.s32.totalorder %s95_s26, %s3995_s0  ;;  %p4001_p11 = scmp.lt.s32.totalorder %s3995_s0, %s3995_s0 }
  0x72   :  { %p4002_p12 = por %p4001_p11, %p4000_p10 }
  0x74   :  { %p4003_p13 = pnand %p4002_p12, %p3996_p9 }
  0x76   :  { %4006 = shalt.err (!%p4003_p13)
}
  0x77   :  { %100 = dma.hbm_to_vmem [thread:$0]  %s4319_s6, 1024, %s95_s26, [#allocation12], %s4067_s1, %s4067_s1, %s4068_s28  }
  0x78   :  { %s4076_s20 = smov [#allocation14]   ;;  %s4007_s25 = scalar_lea.hbm %s4320_s7, 512 }
  0x79   :  { %s107_s22 = sshll.u32 %s4076_s20, 4  ;;  %p4008_p0 = scmp.ne.s32.totalorder %s4320_s7, %s4007_s25  ;;  %s108_s22 = int_to_ptr.vmem [resolvable:$true] %s107_s22 }
  0x7a   :  { %p4011_p1 = scmp.lt.u32.totalorder %s4007_s25, %s4320_s7 }
  0x7c   :  { %p4013_p2 = pnand %p4011_p1, %p4008_p0 }
  0x7e   :  { %4016 = shalt.err (!%p4013_p2)
}
  0x7f   :  { %s4017_s5 = scalar_lea.vmem %s108_s22, 512  ;;  %p4022_p4 = scmp.lt.s32.totalorder %s108_s22, %s108_s22 }
  0x80   :  { %p4018_p3 = scmp.ne.s32.totalorder %s108_s22, %s4017_s5  ;;  %p4023_p5 = scmp.lt.s32.totalorder %s4017_s5, %s4017_s5 }
  0x82   :  { %p4024_p6 = por %p4023_p5, %p4022_p4 }
  0x84   :  { %p4025_p7 = pnand %p4024_p6, %p4018_p3 }
  0x86   :  { %4028 = shalt.err (!%p4025_p7)
}
  0x87   :  { %110 = dma.hbm_to_vmem [thread:$0]  %s4320_s7, 512, %s108_s22, [#allocation15]  }
  0x88   :  { %4051 = dma.done.wait [#allocation3], 448  }
  0x89   :  { %4052 = vsyncadd [#allocation3], 4294966848 }
  0x8a   :  { %4053 = dma.done.wait [#allocation6], 36864  }
  0x8b   :  { %4054 = vsyncadd [#allocation6], 4294930432 }
  0x8c   :  { %4055 = dma.done.wait [#allocation9], 3072  }
  0x8d   :  { %4056 = vsyncadd [#allocation9], 4294964224 }
  0x8e   :  { %4057 = dma.done.wait [#allocation12], 2048  }
  0x8f   :  { %4058 = vsyncadd [#allocation12], 4294965248 }
  0x90   :  { %4059 = dma.done.wait [#allocation15], 512  }
  0x91   :  { %4060 = vsyncadd [#allocation15], 4294966784  ;;  %v3370_v0 = vld [vmem:[#allocation5 + $0x4] ss:$16 sps:$4 sm:$0xff]   ;;  %v3372_v1 = vld [vmem:[#allocation5 + $0xc] ss:$16 sps:$4 sm:$0xff]  }
  0x92   :  { %1531 = vmatprep.subr.bf16.mxu0 %v3370_v0  ;;  %v3374_v2 = vld [vmem:[#allocation5] ss:$16 sps:$4 sm:$0xff]   ;;  %v3375_v3 = vld [vmem:[#allocation5 + $0x8] ss:$16 sps:$4 sm:$0xff]   ;;  %1695 = vmatprep.subr.bf16.mxu1 %v3372_v1  ;;  %v3376_v4 = vld [vmem:[#allocation5 + $0x24] ss:$16 sps:$4 sm:$0xff]  }
  0x93   :  { %1532 = vmatpush1.bf16.msra.mxu0 %v3374_v2  ;;  %1696 = vmatpush1.bf16.msra.mxu1 %v3375_v3  ;;  %v3378_v5 = vld [vmem:[#allocation5 + $0x2c] ss:$16 sps:$4 sm:$0xff]   ;;  %v3380_v6 = vld [vmem:[#allocation5 + $0x20] ss:$16 sps:$4 sm:$0xff]   ;;  %v3381_v7 = vld [vmem:[#allocation5 + $0x28] ss:$16 sps:$4 sm:$0xff]  }
  0x94   :  { %1533 = vmatprep.subr.bf16.mxu0 %v3376_v4  ;;  %1697 = vmatprep.subr.bf16.mxu1 %v3378_v5  ;;  %v3382_v8 = vld [vmem:[#allocation5 + $0x44] ss:$16 sps:$4 sm:$0xff]   ;;  %v3384_v9 = vld [vmem:[#allocation5 + $0x4c] ss:$16 sps:$4 sm:$0xff]   ;;  %v3386_v10 = vld [vmem:[#allocation5 + $0x40] ss:$16 sps:$4 sm:$0xff]  }
  0x95   :  { %v3387_v11 = vld [vmem:[#allocation5 + $0x48] ss:$16 sps:$4 sm:$0xff]   ;;  %v3388_v12 = vld [vmem:[#allocation5 + $0x64] ss:$16 sps:$4 sm:$0xff]   ;;  %v3390_v13 = vld [vmem:[#allocation5 + $0x6c] ss:$16 sps:$4 sm:$0xff]  }
  0x96   :  { %v3392_v14 = vld [vmem:[#allocation5 + $0x60] ss:$16 sps:$4 sm:$0xff]   ;;  %v3393_v15 = vld [vmem:[#allocation5 + $0x68] ss:$16 sps:$4 sm:$0xff]   ;;  %v3394_v16 = vld [vmem:[#allocation5 + $0x84] ss:$16 sps:$4 sm:$0xff]  }
  0x97   :  { %1534 = vmatpush1.bf16.msra.mxu0 %v3380_v6  ;;  %1698 = vmatpush1.bf16.msra.mxu1 %v3381_v7  ;;  %v3396_v17 = vld [vmem:[#allocation5 + $0x8c] ss:$16 sps:$4 sm:$0xff]   ;;  %v3398_v18 = vld [vmem:[#allocation5 + $0x80] ss:$16 sps:$4 sm:$0xff]   ;;  %v3399_v19 = vld [vmem:[#allocation5 + $0x88] ss:$16 sps:$4 sm:$0xff]  }
  0x98   :  { %1535 = vmatprep.subr.bf16.mxu0 %v3382_v8  ;;  %1699 = vmatprep.subr.bf16.mxu1 %v3384_v9  ;;  %v3400_v20 = vld [vmem:[#allocation5 + $0xa4] ss:$16 sps:$4 sm:$0xff]   ;;  %v3402_v21 = vld [vmem:[#allocation5 + $0xac] ss:$16 sps:$4 sm:$0xff]   ;;  %v3404_v22 = vld [vmem:[#allocation5 + $0xa0] ss:$16 sps:$4 sm:$0xff]  }
  0x99   :  { %v3405_v23 = vld [vmem:[#allocation5 + $0xa8] ss:$16 sps:$4 sm:$0xff]   ;;  %v3406_v24 = vld [vmem:[#allocation5 + $0xc4] ss:$16 sps:$4 sm:$0xff]   ;;  %v3408_v25 = vld [vmem:[#allocation5 + $0xcc] ss:$16 sps:$4 sm:$0xff]  }
  0x9a   :  { %v3410_v26 = vld [vmem:[#allocation5 + $0xc0] ss:$16 sps:$4 sm:$0xff]   ;;  %v3411_v27 = vld [vmem:[#allocation5 + $0xc8] ss:$16 sps:$4 sm:$0xff]   ;;  %v3412_v28 = vld [vmem:[#allocation5 + $0xe4] ss:$16 sps:$4 sm:$0xff]  }
  0x9b   :  { %1536 = vmatpush1.bf16.msra.mxu0 %v3386_v10  ;;  %1700 = vmatpush1.bf16.msra.mxu1 %v3387_v11  ;;  %v3414_v29 = vld [vmem:[#allocation5 + $0xec] ss:$16 sps:$4 sm:$0xff]   ;;  %v3416_v30 = vld [vmem:[#allocation5 + $0xe0] ss:$16 sps:$4 sm:$0xff]   ;;  %v3417_v31 = vld [vmem:[#allocation5 + $0xe8] ss:$16 sps:$4 sm:$0xff]  }
  0x9c   :  { %1537 = vmatprep.subr.bf16.mxu0 %v3388_v12  ;;  %1701 = vmatprep.subr.bf16.mxu1 %v3390_v13  ;;  %v3418_v32 = vld [vmem:[#allocation5 + $0x104] ss:$16 sps:$4 sm:$0xff]   ;;  %v3420_v33 = vld [vmem:[#allocation5 + $0x10c] ss:$16 sps:$4 sm:$0xff]   ;;  %v3422_v34 = vld [vmem:[#allocation5 + $0x100] ss:$16 sps:$4 sm:$0xff]  }
  0x9d   :  { %v3423_v35 = vld [vmem:[#allocation5 + $0x108] ss:$16 sps:$4 sm:$0xff]   ;;  %v3424_v36 = vld [vmem:[#allocation5 + $0x124] ss:$16 sps:$4 sm:$0xff]   ;;  %v3426_v37 = vld [vmem:[#allocation5 + $0x12c] ss:$16 sps:$4 sm:$0xff]  }
  0x9e   :  { %v3428_v38 = vld [vmem:[#allocation5 + $0x120] ss:$16 sps:$4 sm:$0xff]   ;;  %v3429_v39 = vld [vmem:[#allocation5 + $0x128] ss:$16 sps:$4 sm:$0xff]   ;;  %v3430_v40 = vld [vmem:[#allocation5 + $0x144] ss:$16 sps:$4 sm:$0xff]  }
  0x9f   :  { %1538 = vmatpush1.bf16.msra.mxu0 %v3392_v14  ;;  %1702 = vmatpush1.bf16.msra.mxu1 %v3393_v15  ;;  %v3432_v41 = vld [vmem:[#allocation5 + $0x14c] ss:$16 sps:$4 sm:$0xff]   ;;  %v3434_v42 = vld [vmem:[#allocation5 + $0x140] ss:$16 sps:$4 sm:$0xff]   ;;  %v3435_v43 = vld [vmem:[#allocation5 + $0x148] ss:$16 sps:$4 sm:$0xff]  }
  0xa0   :  { %1539 = vmatprep.subr.bf16.mxu0 %v3394_v16  ;;  %1703 = vmatprep.subr.bf16.mxu1 %v3396_v17  ;;  %v3436_v44 = vld [vmem:[#allocation5 + $0x164] ss:$16 sps:$4 sm:$0xff]   ;;  %v3438_v45 = vld [vmem:[#allocation5 + $0x16c] ss:$16 sps:$4 sm:$0xff]   ;;  %v3440_v47 = vld [vmem:[#allocation5 + $0x160] ss:$16 sps:$4 sm:$0xff]  }
  0xa1   :  { %v136_v46 = vld [vmem:[#allocation2] sm:$0xff]  ;;  %v3444_v51 = vld [vmem:[#allocation5 + $0x18c] ss:$16 sps:$4 sm:$0xff]   ;;  %v3446_v52 = vld [vmem:[#allocation5 + $0x180] ss:$16 sps:$4 sm:$0xff]   ;;  %vm4079_vm0 = vmmov 0  }
  0xa2   :  { %v2875_v48 = vcombine.high %v136_v46, %v136_v46  ;;  %v3441_v49 = vld [vmem:[#allocation5 + $0x168] ss:$16 sps:$4 sm:$0xff]   ;;  %v3442_v50 = vld [vmem:[#allocation5 + $0x184] ss:$16 sps:$4 sm:$0xff]   ;;  %v3450_v55 = vld [vmem:[#allocation5 + $0x1ac] ss:$16 sps:$4 sm:$0xff]   ;;  %v2874_v4 = vcombine.low %v136_v46, %v136_v46 }
  0xa3   :  { %1540 = vmatpush1.bf16.msra.mxu0 %v3398_v18  ;;  %1704 = vmatpush1.bf16.msra.mxu1 %v3399_v19  ;;  %v3447_v53 = vld [vmem:[#allocation5 + $0x188] ss:$16 sps:$4 sm:$0xff]   ;;  %v3448_v54 = vld [vmem:[#allocation5 + $0x1a4] ss:$16 sps:$4 sm:$0xff]   ;;  %v3452_v56 = vld [vmem:[#allocation5 + $0x1a0] ss:$16 sps:$4 sm:$0xff]  }
  0xa4   :  { %1541 = vmatprep.subr.bf16.mxu0 %v3400_v20  ;;  %1705 = vmatprep.subr.bf16.mxu1 %v3402_v21  ;;  %v3453_v57 = vld [vmem:[#allocation5 + $0x1a8] ss:$16 sps:$4 sm:$0xff]   ;;  %v3454_v58 = vld [vmem:[#allocation5 + $0x1c4] ss:$16 sps:$4 sm:$0xff]   ;;  %v3456_v59 = vld [vmem:[#allocation5 + $0x1cc] ss:$16 sps:$4 sm:$0xff]  }
  0xa5   :  { %1563 = vmatprep.mubr.bf16.mxu0 %v2875_v48  ;;  %1727 = vmatprep.mubr.bf16.mxu1 %v2875_v48  ;;  %v3458_v60 = vld [vmem:[#allocation5 + $0x1c0] ss:$16 sps:$4 sm:$0xff]   ;;  %v3459_v61 = vld [vmem:[#allocation5 + $0x1c8] ss:$16 sps:$4 sm:$0xff]   ;;  %v3460_v62 = vld [vmem:[#allocation5 + $0x1e4] ss:$16 sps:$4 sm:$0xff]  }
  0xa6   :  { %v3462_v63 = vld [vmem:[#allocation5 + $0x1ec] ss:$16 sps:$4 sm:$0xff]   ;;  %v3464_v0 = vld [vmem:[#allocation5 + $0x1e0] ss:$16 sps:$4 sm:$0xff]   ;;  %v3465_v1 = vld [vmem:[#allocation5 + $0x1e8] ss:$16 sps:$4 sm:$0xff]  }
  0xa7   :  { %1542 = vmatpush1.bf16.msra.mxu0 %v3404_v22  ;;  %1706 = vmatpush1.bf16.msra.mxu1 %v3405_v23  ;;  %v3470_v2 = vld [vmem:[#allocation5 + $0x204] ss:$16 sps:$4 sm:$0xff]   ;;  %v3473_v3 = vld [vmem:[#allocation5 + $0x20c] ss:$16 sps:$4 sm:$0xff]   ;;  %v3468_v5 = vld [vmem:[#allocation5 + $0x200] ss:$16 sps:$4 sm:$0xff]  }
  0xa8   :  { %1543 = vmatprep.subr.bf16.mxu0 %v3406_v24  ;;  %1707 = vmatprep.subr.bf16.mxu1 %v3408_v25  ;;  %v3471_v6 = vld [vmem:[#allocation5 + $0x208] ss:$16 sps:$4 sm:$0xff]   ;;  %v3476_v7 = vld [vmem:[#allocation5 + $0x224] ss:$16 sps:$4 sm:$0xff]   ;;  %v3479_v8 = vld [vmem:[#allocation5 + $0x22c] ss:$16 sps:$4 sm:$0xff]  }
  0xa9   :  { %v3474_v9 = vld [vmem:[#allocation5 + $0x220] ss:$16 sps:$4 sm:$0xff]   ;;  %v3477_v10 = vld [vmem:[#allocation5 + $0x228] ss:$16 sps:$4 sm:$0xff]   ;;  %v3482_v11 = vld [vmem:[#allocation5 + $0x244] ss:$16 sps:$4 sm:$0xff]  }
  0xaa   :  { %v3485_v12 = vld [vmem:[#allocation5 + $0x24c] ss:$16 sps:$4 sm:$0xff]   ;;  %v3480_v13 = vld [vmem:[#allocation5 + $0x240] ss:$16 sps:$4 sm:$0xff]   ;;  %v3483_v14 = vld [vmem:[#allocation5 + $0x248] ss:$16 sps:$4 sm:$0xff]  }
  0xab   :  { %1544 = vmatpush1.bf16.msra.mxu0 %v3410_v26  ;;  %1708 = vmatpush1.bf16.msra.mxu1 %v3411_v27  ;;  %v3488_v15 = vld [vmem:[#allocation5 + $0x264] ss:$16 sps:$4 sm:$0xff]   ;;  %v3491_v16 = vld [vmem:[#allocation5 + $0x26c] ss:$16 sps:$4 sm:$0xff]   ;;  %v3486_v17 = vld [vmem:[#allocation5 + $0x260] ss:$16 sps:$4 sm:$0xff]  }
  0xac   :  { %1545 = vmatprep.subr.bf16.mxu0 %v3412_v28  ;;  %1709 = vmatprep.subr.bf16.mxu1 %v3414_v29  ;;  %v3489_v18 = vld [vmem:[#allocation5 + $0x268] ss:$16 sps:$4 sm:$0xff]   ;;  %v3494_v19 = vld [vmem:[#allocation5 + $0x284] ss:$16 sps:$4 sm:$0xff]   ;;  %v3497_v20 = vld [vmem:[#allocation5 + $0x28c] ss:$16 sps:$4 sm:$0xff]  }
  0xad   :  { %v3492_v21 = vld [vmem:[#allocation5 + $0x280] ss:$16 sps:$4 sm:$0xff]   ;;  %v3495_v22 = vld [vmem:[#allocation5 + $0x288] ss:$16 sps:$4 sm:$0xff]   ;;  %v3500_v23 = vld [vmem:[#allocation5 + $0x2a4] ss:$16 sps:$4 sm:$0xff]  }
  0xae   :  { %v3503_v24 = vld [vmem:[#allocation5 + $0x2ac] ss:$16 sps:$4 sm:$0xff]   ;;  %v3498_v25 = vld [vmem:[#allocation5 + $0x2a0] ss:$16 sps:$4 sm:$0xff]   ;;  %v3501_v26 = vld [vmem:[#allocation5 + $0x2a8] ss:$16 sps:$4 sm:$0xff]  }
  0xaf   :  { %1546 = vmatpush1.bf16.msra.mxu0 %v3416_v30  ;;  %1710 = vmatpush1.bf16.msra.mxu1 %v3417_v31  ;;  %v3506_v27 = vld [vmem:[#allocation5 + $0x2c4] ss:$16 sps:$4 sm:$0xff]   ;;  %v3509_v28 = vld [vmem:[#allocation5 + $0x2cc] ss:$16 sps:$4 sm:$0xff]   ;;  %v3504_v31 = vld [vmem:[#allocation5 + $0x2c0] ss:$16 sps:$4 sm:$0xff]  }
  0xb0   :  { %1547 = vmatprep.subr.bf16.mxu0 %v3418_v32  ;;  %1711 = vmatprep.subr.bf16.mxu1 %v3420_v33  ;;  %v4234_v29 = vld [vmem:[#allocation2 + $0x8] sm:$0xff]  ;;  %v3507_v32 = vld [vmem:[#allocation5 + $0x2c8] ss:$16 sps:$4 sm:$0xff]   ;;  %v3512_v33 = vld [vmem:[#allocation5 + $0x2e4] ss:$16 sps:$4 sm:$0xff]   ;;  %s4080_s7 = smov [#allocation16]  }
  0xb1   :  { %v2877_v30 = vcombine.high %v4234_v29, %v4234_v29  ;;  %v3533_v46 = vld [vmem:[#allocation5 + $0x34c] ss:$16 sps:$4 sm:$0xff]   ;;  %v3531_v48 = vld [vmem:[#allocation5 + $0x348] ss:$16 sps:$4 sm:$0xff]   ;;  %s2861_s28 = sshll.u32 %s4080_s7, 4  ;;  %s2862_s28 = int_to_ptr.vmem [resolvable:$true] %s2861_s28 }
  0xb2   :  { %s4029_s26 = scalar_lea.vmem %s2862_s28, 128  ;;  %p4034_p9 = scmp.lt.s32.totalorder %s2862_s28, %s2862_s28 }
  0xb3   :  { %1548 = vmatpush1.bf16.msra.mxu0 %v3422_v34  ;;  %1712 = vmatpush1.bf16.msra.mxu1 %v3423_v35  ;;  %v3515_v34 = vld [vmem:[#allocation5 + $0x2ec] ss:$16 sps:$4 sm:$0xff]   ;;  %v3510_v35 = vld [vmem:[#allocation5 + $0x2e0] ss:$16 sps:$4 sm:$0xff]   ;;  %p4030_p8 = scmp.ne.s32.totalorder %s2862_s28, %s4029_s26  ;;  %p4035_p10 = scmp.lt.s32.totalorder %s4029_s26, %s4029_s26 }
  0xb4   :  { %1549 = vmatprep.subr.bf16.mxu0 %v3424_v36  ;;  %1713 = vmatprep.subr.bf16.mxu1 %v3426_v37  ;;  %v3513_v36 = vld [vmem:[#allocation5 + $0x2e8] ss:$16 sps:$4 sm:$0xff]   ;;  %v3518_v37 = vld [vmem:[#allocation5 + $0x304] ss:$16 sps:$4 sm:$0xff]  }
  0xb5   :  { %p4036_p11 = por %p4035_p10, %p4034_p9 }
  0xb7   :  { %1550 = vmatpush1.bf16.msra.mxu0 %v3428_v38  ;;  %1714 = vmatpush1.bf16.msra.mxu1 %v3429_v39  ;;  %v3521_v38 = vld [vmem:[#allocation5 + $0x30c] ss:$16 sps:$4 sm:$0xff]   ;;  %v3516_v39 = vld [vmem:[#allocation5 + $0x300] ss:$16 sps:$4 sm:$0xff]   ;;  %p4037_p12 = pnand %p4036_p11, %p4030_p8 }
  0xb8   :  { %1551 = vmatprep.subr.bf16.mxu0 %v3430_v40  ;;  %1715 = vmatprep.subr.bf16.mxu1 %v3432_v41  ;;  %v3519_v40 = vld [vmem:[#allocation5 + $0x308] ss:$16 sps:$4 sm:$0xff]   ;;  %v3524_v41 = vld [vmem:[#allocation5 + $0x324] ss:$16 sps:$4 sm:$0xff]  }
  0xbb   :  { %1552 = vmatpush1.bf16.msra.mxu0 %v3434_v42  ;;  %1716 = vmatpush1.bf16.msra.mxu1 %v3435_v43  ;;  %v3527_v42 = vld [vmem:[#allocation5 + $0x32c] ss:$16 sps:$4 sm:$0xff]   ;;  %v3522_v43 = vld [vmem:[#allocation5 + $0x320] ss:$16 sps:$4 sm:$0xff]  }
  0xbc   :  { %1553 = vmatprep.subr.bf16.mxu0 %v3436_v44  ;;  %1717 = vmatprep.subr.bf16.mxu1 %v3438_v45  ;;  %v3525_v44 = vld [vmem:[#allocation5 + $0x328] ss:$16 sps:$4 sm:$0xff]   ;;  %v3530_v45 = vld [vmem:[#allocation5 + $0x344] ss:$16 sps:$4 sm:$0xff]  }
  0xbf   :  { %1554 = vmatpush1.bf16.msra.mxu0 %v3440_v47  ;;  %1718 = vmatpush1.bf16.msra.mxu1 %v3441_v49  ;;  %v3528_v47 = vld [vmem:[#allocation5 + $0x340] ss:$16 sps:$4 sm:$0xff]   ;;  %v3536_v49 = vld [vmem:[#allocation5 + $0x364] ss:$16 sps:$4 sm:$0xff]  }
  0xc0   :  { %1555 = vmatprep.subr.bf16.mxu0 %v3442_v50  ;;  %1719 = vmatprep.subr.bf16.mxu1 %v3444_v51  ;;  %v3539_v50 = vld [vmem:[#allocation5 + $0x36c] ss:$16 sps:$4 sm:$0xff]   ;;  %v3534_v51 = vld [vmem:[#allocation5 + $0x360] ss:$16 sps:$4 sm:$0xff]  }
  0xc3   :  { %1556 = vmatpush1.bf16.msra.mxu0 %v3446_v52  ;;  %1720 = vmatpush1.bf16.msra.mxu1 %v3447_v53  ;;  %v3537_v52 = vld [vmem:[#allocation5 + $0x368] ss:$16 sps:$4 sm:$0xff]   ;;  %v3542_v53 = vld [vmem:[#allocation5 + $0x384] ss:$16 sps:$4 sm:$0xff]  }
  0xc4   :  { %1557 = vmatprep.subr.bf16.mxu0 %v3448_v54  ;;  %1721 = vmatprep.subr.bf16.mxu1 %v3450_v55  ;;  %v3545_v54 = vld [vmem:[#allocation5 + $0x38c] ss:$16 sps:$4 sm:$0xff]   ;;  %v3540_v55 = vld [vmem:[#allocation5 + $0x380] ss:$16 sps:$4 sm:$0xff]  }
  0xc7   :  { %1558 = vmatpush1.bf16.msra.mxu0 %v3452_v56  ;;  %1722 = vmatpush1.bf16.msra.mxu1 %v3453_v57  ;;  %v3543_v56 = vld [vmem:[#allocation5 + $0x388] ss:$16 sps:$4 sm:$0xff]   ;;  %v3548_v57 = vld [vmem:[#allocation5 + $0x3a4] ss:$16 sps:$4 sm:$0xff]  }
  0xc8   :  { %1559 = vmatprep.subr.bf16.mxu0 %v3454_v58  ;;  %1723 = vmatprep.subr.bf16.mxu1 %v3456_v59  ;;  %v3551_v58 = vld [vmem:[#allocation5 + $0x3ac] ss:$16 sps:$4 sm:$0xff]   ;;  %v3546_v59 = vld [vmem:[#allocation5 + $0x3a0] ss:$16 sps:$4 sm:$0xff]  }
  0xcb   :  { %1560 = vmatpush1.bf16.msra.mxu0 %v3458_v60  ;;  %1724 = vmatpush1.bf16.msra.mxu1 %v3459_v61  ;;  %v3549_v60 = vld [vmem:[#allocation5 + $0x3a8] ss:$16 sps:$4 sm:$0xff]   ;;  %v3554_v61 = vld [vmem:[#allocation5 + $0x3c4] ss:$16 sps:$4 sm:$0xff]  }
  0xcc   :  { %1561 = vmatprep.subr.bf16.mxu0 %v3460_v62  ;;  %1725 = vmatprep.subr.bf16.mxu1 %v3462_v63  ;;  %v3557_v62 = vld [vmem:[#allocation5 + $0x3cc] ss:$16 sps:$4 sm:$0xff]   ;;  %v3552_v63 = vld [vmem:[#allocation5 + $0x3c0] ss:$16 sps:$4 sm:$0xff]  }
  0xcf   :  { %1562 = vmatpush1.bf16.msra.mxu0 %v3464_v0  ;;  %1726 = vmatpush1.bf16.msra.mxu1 %v3465_v1  ;;  %v3555_v0 = vld [vmem:[#allocation5 + $0x3c8] ss:$16 sps:$4 sm:$0xff]   ;;  %v3560_v1 = vld [vmem:[#allocation5 + $0x3e4] ss:$16 sps:$4 sm:$0xff]  }
  0xd0   :  { %1572 = vmatprep.subr.bf16.mxu0 %v3470_v2  ;;  %1736 = vmatprep.subr.bf16.mxu1 %v3473_v3  ;;  %v3563_v2 = vld [vmem:[#allocation5 + $0x3ec] ss:$16 sps:$4 sm:$0xff]   ;;  %v3558_v3 = vld [vmem:[#allocation5 + $0x3e0] ss:$16 sps:$4 sm:$0xff]  }
  0xd2   :  { %1564 = vmatmul.mubr.bf16.vlgmr.msra.gmra.mrb[0].mxu0 %v2874_v4  ;;  %1728 = vmatmul.mubr.bf16.vlgmr.msra.gmra.mrb[0].mxu1 %v2874_v4  ;;  %v3561_v4 = vld [vmem:[#allocation5 + $0x3e8] ss:$16 sps:$4 sm:$0xff]  }
  0xd3   :  { %1573 = vmatpush1.bf16.msra.mxu0 %v3468_v5  ;;  %1737 = vmatpush1.bf16.msra.mxu1 %v3471_v6  ;;  %v3568_v5 = vld [vmem:[#allocation5 + $0x404] ss:$16 sps:$4 sm:$0xff]   ;;  %v3571_v6 = vld [vmem:[#allocation5 + $0x40c] ss:$16 sps:$4 sm:$0xff]  }
  0xd4   :  { %1574 = vmatprep.subr.bf16.mxu0 %v3476_v7  ;;  %1738 = vmatprep.subr.bf16.mxu1 %v3479_v8  ;;  %v2876_v7 = vcombine.low %v4234_v29, %v4234_v29  ;;  %v3566_v8 = vld [vmem:[#allocation5 + $0x400] ss:$16 sps:$4 sm:$0xff]   ;;  %v3601_v29 = vld [vmem:[#allocation5 + $0x4ac] ss:$16 sps:$4 sm:$0xff]  }
  0xd5   :  { %1604 = vmatprep.mubr.bf16.mxu0 %v2877_v30  ;;  %1768 = vmatprep.mubr.bf16.mxu1 %v2877_v30  ;;  %v3596_v30 = vld [vmem:[#allocation5 + $0x4a0] ss:$16 sps:$4 sm:$0xff]  }
  0xd7   :  { %1575 = vmatpush1.bf16.msra.mxu0 %v3474_v9  ;;  %1739 = vmatpush1.bf16.msra.mxu1 %v3477_v10  ;;  %v3569_v9 = vld [vmem:[#allocation5 + $0x408] ss:$16 sps:$4 sm:$0xff]   ;;  %v3574_v10 = vld [vmem:[#allocation5 + $0x424] ss:$16 sps:$4 sm:$0xff]  }
  0xd8   :  { %1576 = vmatprep.subr.bf16.mxu0 %v3482_v11  ;;  %1740 = vmatprep.subr.bf16.mxu1 %v3485_v12  ;;  %v4240_v11 = vld [vmem:[#allocation2 + $0x10] sm:$0xff]  ;;  %v3577_v12 = vld [vmem:[#allocation5 + $0x42c] ss:$16 sps:$4 sm:$0xff]  }
  0xdb   :  { %1577 = vmatpush1.bf16.msra.mxu0 %v3480_v13  ;;  %1741 = vmatpush1.bf16.msra.mxu1 %v3483_v14  ;;  %v2879_v13 = vcombine.high %v4240_v11, %v4240_v11  ;;  %v3572_v14 = vld [vmem:[#allocation5 + $0x420] ss:$16 sps:$4 sm:$0xff]  }
  0xdc   :  { %1578 = vmatprep.subr.bf16.mxu0 %v3488_v15  ;;  %1742 = vmatprep.subr.bf16.mxu1 %v3491_v16  ;;  %v3575_v15 = vld [vmem:[#allocation5 + $0x428] ss:$16 sps:$4 sm:$0xff]   ;;  %v3580_v16 = vld [vmem:[#allocation5 + $0x444] ss:$16 sps:$4 sm:$0xff]  }
  0xdf   :  { %1579 = vmatpush1.bf16.msra.mxu0 %v3486_v17  ;;  %1743 = vmatpush1.bf16.msra.mxu1 %v3489_v18  ;;  %v3583_v17 = vld [vmem:[#allocation5 + $0x44c] ss:$16 sps:$4 sm:$0xff]   ;;  %v3578_v18 = vld [vmem:[#allocation5 + $0x440] ss:$16 sps:$4 sm:$0xff]  }
  0xe0   :  { %1580 = vmatprep.subr.bf16.mxu0 %v3494_v19  ;;  %1744 = vmatprep.subr.bf16.mxu1 %v3497_v20  ;;  %v3581_v19 = vld [vmem:[#allocation5 + $0x448] ss:$16 sps:$4 sm:$0xff]   ;;  %v3586_v20 = vld [vmem:[#allocation5 + $0x464] ss:$16 sps:$4 sm:$0xff]  }
  0xe3   :  { %1581 = vmatpush1.bf16.msra.mxu0 %v3492_v21  ;;  %1745 = vmatpush1.bf16.msra.mxu1 %v3495_v22  ;;  %v3589_v21 = vld [vmem:[#allocation5 + $0x46c] ss:$16 sps:$4 sm:$0xff]   ;;  %v3584_v22 = vld [vmem:[#allocation5 + $0x460] ss:$16 sps:$4 sm:$0xff]  }
  0xe4   :  { %1582 = vmatprep.subr.bf16.mxu0 %v3500_v23  ;;  %1746 = vmatprep.subr.bf16.mxu1 %v3503_v24  ;;  %v3587_v23 = vld [vmem:[#allocation5 + $0x468] ss:$16 sps:$4 sm:$0xff]   ;;  %v3592_v24 = vld [vmem:[#allocation5 + $0x484] ss:$16 sps:$4 sm:$0xff]  }
  0xe7   :  { %1583 = vmatpush1.bf16.msra.mxu0 %v3498_v25  ;;  %1747 = vmatpush1.bf16.msra.mxu1 %v3501_v26  ;;  %v3595_v25 = vld [vmem:[#allocation5 + $0x48c] ss:$16 sps:$4 sm:$0xff]   ;;  %v3590_v26 = vld [vmem:[#allocation5 + $0x480] ss:$16 sps:$4 sm:$0xff]  }
  0xe8   :  { %1584 = vmatprep.subr.bf16.mxu0 %v3506_v27  ;;  %1748 = vmatprep.subr.bf16.mxu1 %v3509_v28  ;;  %v3593_v27 = vld [vmem:[#allocation5 + $0x488] ss:$16 sps:$4 sm:$0xff]   ;;  %v3598_v28 = vld [vmem:[#allocation5 + $0x4a4] ss:$16 sps:$4 sm:$0xff]  }
  0xeb   :  { %1585 = vmatpush1.bf16.msra.mxu0 %v3504_v31  ;;  %1749 = vmatpush1.bf16.msra.mxu1 %v3507_v32  ;;  %v3599_v31 = vld [vmem:[#allocation5 + $0x4a8] ss:$16 sps:$4 sm:$0xff]   ;;  %v3604_v32 = vld [vmem:[#allocation5 + $0x4c4] ss:$16 sps:$4 sm:$0xff]  }
  0xec   :  { %1586 = vmatprep.subr.bf16.mxu0 %v3512_v33  ;;  %1750 = vmatprep.subr.bf16.mxu1 %v3515_v34  ;;  %v3607_v33 = vld [vmem:[#allocation5 + $0x4cc] ss:$16 sps:$4 sm:$0xff]   ;;  %v3602_v34 = vld [vmem:[#allocation5 + $0x4c0] ss:$16 sps:$4 sm:$0xff]  }
  0xef   :  { %1587 = vmatpush1.bf16.msra.mxu0 %v3510_v35  ;;  %1751 = vmatpush1.bf16.msra.mxu1 %v3513_v36  ;;  %v3605_v35 = vld [vmem:[#allocation5 + $0x4c8] ss:$16 sps:$4 sm:$0xff]   ;;  %v3610_v36 = vld [vmem:[#allocation5 + $0x4e4] ss:$16 sps:$4 sm:$0xff]  }
  0xf0   :  { %1588 = vmatprep.subr.bf16.mxu0 %v3518_v37  ;;  %1752 = vmatprep.subr.bf16.mxu1 %v3521_v38  ;;  %v3613_v37 = vld [vmem:[#allocation5 + $0x4ec] ss:$16 sps:$4 sm:$0xff]   ;;  %v3608_v38 = vld [vmem:[#allocation5 + $0x4e0] ss:$16 sps:$4 sm:$0xff]  }
  0xf3   :  { %1589 = vmatpush1.bf16.msra.mxu0 %v3516_v39  ;;  %1753 = vmatpush1.bf16.msra.mxu1 %v3519_v40  ;;  %v3611_v39 = vld [vmem:[#allocation5 + $0x4e8] ss:$16 sps:$4 sm:$0xff]   ;;  %v3616_v40 = vld [vmem:[#allocation5 + $0x504] ss:$16 sps:$4 sm:$0xff]  }
  0xf4   :  { %1590 = vmatprep.subr.bf16.mxu0 %v3524_v41  ;;  %1754 = vmatprep.subr.bf16.mxu1 %v3527_v42  ;;  %v3619_v41 = vld [vmem:[#allocation5 + $0x50c] ss:$16 sps:$4 sm:$0xff]   ;;  %v3614_v42 = vld [vmem:[#allocation5 + $0x500] ss:$16 sps:$4 sm:$0xff]  }
  0xf7   :  { %1591 = vmatpush1.bf16.msra.mxu0 %v3522_v43  ;;  %1755 = vmatpush1.bf16.msra.mxu1 %v3525_v44  ;;  %v3617_v43 = vld [vmem:[#allocation5 + $0x508] ss:$16 sps:$4 sm:$0xff]   ;;  %v3622_v44 = vld [vmem:[#allocation5 + $0x524] ss:$16 sps:$4 sm:$0xff]  }
  0xf8   :  { %1592 = vmatprep.subr.bf16.mxu0 %v3530_v45  ;;  %1756 = vmatprep.subr.bf16.mxu1 %v3533_v46  ;;  %v3625_v45 = vld [vmem:[#allocation5 + $0x52c] ss:$16 sps:$4 sm:$0xff]   ;;  %v3620_v46 = vld [vmem:[#allocation5 + $0x520] ss:$16 sps:$4 sm:$0xff]  }
  0xfb   :  { %1593 = vmatpush1.bf16.msra.mxu0 %v3528_v47  ;;  %1757 = vmatpush1.bf16.msra.mxu1 %v3531_v48  ;;  %v3623_v47 = vld [vmem:[#allocation5 + $0x528] ss:$16 sps:$4 sm:$0xff]   ;;  %v3628_v48 = vld [vmem:[#allocation5 + $0x544] ss:$16 sps:$4 sm:$0xff]  }
  0xfc   :  { %1594 = vmatprep.subr.bf16.mxu0 %v3536_v49  ;;  %1758 = vmatprep.subr.bf16.mxu1 %v3539_v50  ;;  %v3631_v49 = vld [vmem:[#allocation5 + $0x54c] ss:$16 sps:$4 sm:$0xff]   ;;  %v3626_v50 = vld [vmem:[#allocation5 + $0x540] ss:$16 sps:$4 sm:$0xff]  }
  0xff   :  { %1595 = vmatpush1.bf16.msra.mxu0 %v3534_v51  ;;  %1759 = vmatpush1.bf16.msra.mxu1 %v3537_v52  ;;  %v3629_v51 = vld [vmem:[#allocation5 + $0x548] ss:$16 sps:$4 sm:$0xff]   ;;  %v3634_v52 = vld [vmem:[#allocation5 + $0x564] ss:$16 sps:$4 sm:$0xff]  }
 0x100   :  { %1596 = vmatprep.subr.bf16.mxu0 %v3542_v53  ;;  %1760 = vmatprep.subr.bf16.mxu1 %v3545_v54  ;;  %v3637_v53 = vld [vmem:[#allocation5 + $0x56c] ss:$16 sps:$4 sm:$0xff]   ;;  %v3632_v54 = vld [vmem:[#allocation5 + $0x560] ss:$16 sps:$4 sm:$0xff]  }
 0x103   :  { %1597 = vmatpush1.bf16.msra.mxu0 %v3540_v55  ;;  %1761 = vmatpush1.bf16.msra.mxu1 %v3543_v56  ;;  %v3635_v55 = vld [vmem:[#allocation5 + $0x568] ss:$16 sps:$4 sm:$0xff]   ;;  %v3640_v56 = vld [vmem:[#allocation5 + $0x584] ss:$16 sps:$4 sm:$0xff]  }
 0x104   :  { %1598 = vmatprep.subr.bf16.mxu0 %v3548_v57  ;;  %1762 = vmatprep.subr.bf16.mxu1 %v3551_v58  ;;  %v3643_v57 = vld [vmem:[#allocation5 + $0x58c] ss:$16 sps:$4 sm:$0xff]   ;;  %v3638_v58 = vld [vmem:[#allocation5 + $0x580] ss:$16 sps:$4 sm:$0xff]  }
 0x107   :  { %1599 = vmatpush1.bf16.msra.mxu0 %v3546_v59  ;;  %1763 = vmatpush1.bf16.msra.mxu1 %v3549_v60  ;;  %v3641_v59 = vld [vmem:[#allocation5 + $0x588] ss:$16 sps:$4 sm:$0xff]   ;;  %v3646_v60 = vld [vmem:[#allocation5 + $0x5a4] ss:$16 sps:$4 sm:$0xff]  }
 0x108   :  { %1600 = vmatprep.subr.bf16.mxu0 %v3554_v61  ;;  %1764 = vmatprep.subr.bf16.mxu1 %v3557_v62  ;;  %v3649_v61 = vld [vmem:[#allocation5 + $0x5ac] ss:$16 sps:$4 sm:$0xff]   ;;  %v3644_v62 = vld [vmem:[#allocation5 + $0x5a0] ss:$16 sps:$4 sm:$0xff]  }
 0x10b   :  { %1601 = vmatpush1.bf16.msra.mxu0 %v3552_v63  ;;  %1765 = vmatpush1.bf16.msra.mxu1 %v3555_v0  ;;  %v3647_v63 = vld [vmem:[#allocation5 + $0x5a8] ss:$16 sps:$4 sm:$0xff]   ;;  %v3652_v0 = vld [vmem:[#allocation5 + $0x5c4] ss:$16 sps:$4 sm:$0xff]  }
 0x10c   :  { %1602 = vmatprep.subr.bf16.mxu0 %v3560_v1  ;;  %1766 = vmatprep.subr.bf16.mxu1 %v3563_v2  ;;  %v3655_v1 = vld [vmem:[#allocation5 + $0x5cc] ss:$16 sps:$4 sm:$0xff]   ;;  %v3650_v2 = vld [vmem:[#allocation5 + $0x5c0] ss:$16 sps:$4 sm:$0xff]  }
 0x10f   :  { %1603 = vmatpush1.bf16.msra.mxu0 %v3558_v3  ;;  %1767 = vmatpush1.bf16.msra.mxu1 %v3561_v4  ;;  %v3653_v3 = vld [vmem:[#allocation5 + $0x5c8] ss:$16 sps:$4 sm:$0xff]   ;;  %v3658_v4 = vld [vmem:[#allocation5 + $0x5e4] ss:$16 sps:$4 sm:$0xff]  }
 0x110   :  { %1613 = vmatprep.subr.bf16.mxu0 %v3568_v5  ;;  %1777 = vmatprep.subr.bf16.mxu1 %v3571_v6  ;;  %v3661_v5 = vld [vmem:[#allocation5 + $0x5ec] ss:$16 sps:$4 sm:$0xff]   ;;  %v3656_v6 = vld [vmem:[#allocation5 + $0x5e0] ss:$16 sps:$4 sm:$0xff]  }
 0x112   :  { %1605 = vmatmul.mubr.bf16.vlgmr.msra.gmra.mrb[0].mxu0 %v2876_v7  ;;  %1769 = vmatmul.mubr.bf16.vlgmr.msra.gmra.mrb[0].mxu1 %v2876_v7  ;;  %v3659_v7 = vld [vmem:[#allocation5 + $0x5e8] ss:$16 sps:$4 sm:$0xff]  }
 0x113   :  { %1614 = vmatpush1.bf16.msra.mxu0 %v3566_v8  ;;  %1778 = vmatpush1.bf16.msra.mxu1 %v3569_v9  ;;  %v3666_v8 = vld [vmem:[#allocation5 + $0x604] ss:$16 sps:$4 sm:$0xff]   ;;  %v3669_v9 = vld [vmem:[#allocation5 + $0x60c] ss:$16 sps:$4 sm:$0xff]  }
 0x114   :  { %1615 = vmatprep.subr.bf16.mxu0 %v3574_v10  ;;  %1779 = vmatprep.subr.bf16.mxu1 %v3577_v12  ;;  %v3664_v10 = vld [vmem:[#allocation5 + $0x600] ss:$16 sps:$4 sm:$0xff]   ;;  %v3667_v12 = vld [vmem:[#allocation5 + $0x608] ss:$16 sps:$4 sm:$0xff]  }
 0x115   :  { %1645 = vmatprep.mubr.bf16.mxu0 %v2879_v13  ;;  %1809 = vmatprep.mubr.bf16.mxu1 %v2879_v13  ;;  %v2878_v13 = vcombine.low %v4240_v11, %v4240_v11  ;;  %v3684_v11 = vld [vmem:[#allocation5 + $0x664] ss:$16 sps:$4 sm:$0xff]  }
 0x117   :  { %1616 = vmatpush1.bf16.msra.mxu0 %v3572_v14  ;;  %1780 = vmatpush1.bf16.msra.mxu1 %v3575_v15  ;;  %v3672_v14 = vld [vmem:[#allocation5 + $0x624] ss:$16 sps:$4 sm:$0xff]   ;;  %v3675_v15 = vld [vmem:[#allocation5 + $0x62c] ss:$16 sps:$4 sm:$0xff]  }
 0x118   :  { %1617 = vmatprep.subr.bf16.mxu0 %v3580_v16  ;;  %1781 = vmatprep.subr.bf16.mxu1 %v3583_v17  ;;  %v3670_v16 = vld [vmem:[#allocation5 + $0x620] ss:$16 sps:$4 sm:$0xff]   ;;  %v3673_v17 = vld [vmem:[#allocation5 + $0x628] ss:$16 sps:$4 sm:$0xff]  }
 0x11b   :  { %1618 = vmatpush1.bf16.msra.mxu0 %v3578_v18  ;;  %1782 = vmatpush1.bf16.msra.mxu1 %v3581_v19  ;;  %v3678_v18 = vld [vmem:[#allocation5 + $0x644] ss:$16 sps:$4 sm:$0xff]   ;;  %v3681_v19 = vld [vmem:[#allocation5 + $0x64c] ss:$16 sps:$4 sm:$0xff]  }
 0x11c   :  { %1619 = vmatprep.subr.bf16.mxu0 %v3586_v20  ;;  %1783 = vmatprep.subr.bf16.mxu1 %v3589_v21  ;;  %v3676_v20 = vld [vmem:[#allocation5 + $0x640] ss:$16 sps:$4 sm:$0xff]   ;;  %v3679_v21 = vld [vmem:[#allocation5 + $0x648] ss:$16 sps:$4 sm:$0xff]  }
 0x11f   :  { %1620 = vmatpush1.bf16.msra.mxu0 %v3584_v22  ;;  %1784 = vmatpush1.bf16.msra.mxu1 %v3587_v23  ;;  %v4077_v22 = vmov 0   ;;  %v3687_v23 = vld [vmem:[#allocation5 + $0x66c] ss:$16 sps:$4 sm:$0xff]  }
 0x120   :  { %1621 = vmatprep.subr.bf16.mxu0 %v3592_v24  ;;  %1785 = vmatprep.subr.bf16.mxu1 %v3595_v25  ;;  %v3682_v24 = vld [vmem:[#allocation5 + $0x660] ss:$16 sps:$4 sm:$0xff]   ;;  %v3685_v25 = vld [vmem:[#allocation5 + $0x668] ss:$16 sps:$4 sm:$0xff]  }
 0x123   :  { %1622 = vmatpush1.bf16.msra.mxu0 %v3590_v26  ;;  %1786 = vmatpush1.bf16.msra.mxu1 %v3593_v27  ;;  %v3690_v26 = vld [vmem:[#allocation5 + $0x684] ss:$16 sps:$4 sm:$0xff]   ;;  %v3693_v27 = vld [vmem:[#allocation5 + $0x68c] ss:$16 sps:$4 sm:$0xff]  }
 0x124   :  { %1623 = vmatprep.subr.bf16.mxu0 %v3598_v28  ;;  %1787 = vmatprep.subr.bf16.mxu1 %v3601_v29  ;;  %v3688_v28 = vld [vmem:[#allocation5 + $0x680] ss:$16 sps:$4 sm:$0xff]   ;;  %v3691_v29 = vld [vmem:[#allocation5 + $0x688] ss:$16 sps:$4 sm:$0xff]  }
 0x127   :  { %1624 = vmatpush1.bf16.msra.mxu0 %v3596_v30  ;;  %1788 = vmatpush1.bf16.msra.mxu1 %v3599_v31  ;;  %v3696_v30 = vld [vmem:[#allocation5 + $0x6a4] ss:$16 sps:$4 sm:$0xff]   ;;  %v3699_v31 = vld [vmem:[#allocation5 + $0x6ac] ss:$16 sps:$4 sm:$0xff]  }
 0x128   :  { %1625 = vmatprep.subr.bf16.mxu0 %v3604_v32  ;;  %1789 = vmatprep.subr.bf16.mxu1 %v3607_v33  ;;  %v3694_v32 = vld [vmem:[#allocation5 + $0x6a0] ss:$16 sps:$4 sm:$0xff]   ;;  %v3697_v33 = vld [vmem:[#allocation5 + $0x6a8] ss:$16 sps:$4 sm:$0xff]  }
 0x12b   :  { %1626 = vmatpush1.bf16.msra.mxu0 %v3602_v34  ;;  %1790 = vmatpush1.bf16.msra.mxu1 %v3605_v35  ;;  %v3702_v34 = vld [vmem:[#allocation5 + $0x6c4] ss:$16 sps:$4 sm:$0xff]   ;;  %v3705_v35 = vld [vmem:[#allocation5 + $0x6cc] ss:$16 sps:$4 sm:$0xff]  }
 0x12c   :  { %1627 = vmatprep.subr.bf16.mxu0 %v3610_v36  ;;  %1791 = vmatprep.subr.bf16.mxu1 %v3613_v37  ;;  %v3700_v36 = vld [vmem:[#allocation5 + $0x6c0] ss:$16 sps:$4 sm:$0xff]   ;;  %v3703_v37 = vld [vmem:[#allocation5 + $0x6c8] ss:$16 sps:$4 sm:$0xff]  }
 0x12f   :  { %1628 = vmatpush1.bf16.msra.mxu0 %v3608_v38  ;;  %1792 = vmatpush1.bf16.msra.mxu1 %v3611_v39  ;;  %v3708_v38 = vld [vmem:[#allocation5 + $0x6e4] ss:$16 sps:$4 sm:$0xff]   ;;  %v3711_v39 = vld [vmem:[#allocation5 + $0x6ec] ss:$16 sps:$4 sm:$0xff]  }
 0x130   :  { %1629 = vmatprep.subr.bf16.mxu0 %v3616_v40  ;;  %1793 = vmatprep.subr.bf16.mxu1 %v3619_v41  ;;  %v3706_v40 = vld [vmem:[#allocation5 + $0x6e0] ss:$16 sps:$4 sm:$0xff]   ;;  %v3709_v41 = vld [vmem:[#allocation5 + $0x6e8] ss:$16 sps:$4 sm:$0xff]  }
 0x133   :  { %1630 = vmatpush1.bf16.msra.mxu0 %v3614_v42  ;;  %1794 = vmatpush1.bf16.msra.mxu1 %v3617_v43  ;;  %v3715_v42 = vld [vmem:[#allocation7 + $0x4] ss:$8 sps:$4 sm:$0xff]   ;;  %v3712_v43 = vld [vmem:[#allocation2 + $0x18] ss:$0 sps:$4 sm:$0xff]  }
 0x134   :  { %1631 = vmatprep.subr.bf16.mxu0 %v3622_v44  ;;  %1795 = vmatprep.subr.bf16.mxu1 %v3625_v45  ;;  %v3713_v44 = vld [vmem:[#allocation7] ss:$8 sps:$4 sm:$0xff]   ;;  %v3718_v45 = vld [vmem:[#allocation7 + $0x14] ss:$8 sps:$4 sm:$0xff]  }
 0x137   :  { %1632 = vmatpush1.bf16.msra.mxu0 %v3620_v46  ;;  %1796 = vmatpush1.bf16.msra.mxu1 %v3623_v47  ;;  %v3716_v46 = vld [vmem:[#allocation7 + $0x10] ss:$8 sps:$4 sm:$0xff]   ;;  %v3721_v47 = vld [vmem:[#allocation7 + $0x24] ss:$8 sps:$4 sm:$0xff]  }
 0x138   :  { %1633 = vmatprep.subr.bf16.mxu0 %v3628_v48  ;;  %1797 = vmatprep.subr.bf16.mxu1 %v3631_v49  ;;  %v3719_v48 = vld [vmem:[#allocation7 + $0x20] ss:$8 sps:$4 sm:$0xff]   ;;  %v3724_v49 = vld [vmem:[#allocation7 + $0x34] ss:$8 sps:$4 sm:$0xff]  }
 0x13b   :  { %1634 = vmatpush1.bf16.msra.mxu0 %v3626_v50  ;;  %1798 = vmatpush1.bf16.msra.mxu1 %v3629_v51  ;;  %v3722_v50 = vld [vmem:[#allocation7 + $0x30] ss:$8 sps:$4 sm:$0xff]   ;;  %v3727_v51 = vld [vmem:[#allocation7 + $0x44] ss:$8 sps:$4 sm:$0xff]  }
 0x13c   :  { %1635 = vmatprep.subr.bf16.mxu0 %v3634_v52  ;;  %1799 = vmatprep.subr.bf16.mxu1 %v3637_v53  ;;  %v3725_v52 = vld [vmem:[#allocation7 + $0x40] ss:$8 sps:$4 sm:$0xff]   ;;  %v3730_v53 = vld [vmem:[#allocation7 + $0x54] ss:$8 sps:$4 sm:$0xff]  }
 0x13f   :  { %1636 = vmatpush1.bf16.msra.mxu0 %v3632_v54  ;;  %1800 = vmatpush1.bf16.msra.mxu1 %v3635_v55  ;;  %v3728_v54 = vld [vmem:[#allocation7 + $0x50] ss:$8 sps:$4 sm:$0xff]   ;;  %v3733_v55 = vld [vmem:[#allocation7 + $0x64] ss:$8 sps:$4 sm:$0xff]  }
 0x140   :  { %1637 = vmatprep.subr.bf16.mxu0 %v3640_v56  ;;  %1801 = vmatprep.subr.bf16.mxu1 %v3643_v57  ;;  %v3731_v56 = vld [vmem:[#allocation7 + $0x60] ss:$8 sps:$4 sm:$0xff]   ;;  %v3736_v57 = vld [vmem:[#allocation7 + $0x74] ss:$8 sps:$4 sm:$0xff]  }
 0x143   :  { %1638 = vmatpush1.bf16.msra.mxu0 %v3638_v58  ;;  %1802 = vmatpush1.bf16.msra.mxu1 %v3641_v59  ;;  %v3734_v58 = vld [vmem:[#allocation7 + $0x70] ss:$8 sps:$4 sm:$0xff]   ;;  %v3739_v59 = vld [vmem:[#allocation7 + $0x84] ss:$8 sps:$4 sm:$0xff]  }
 0x144   :  { %1639 = vmatprep.subr.bf16.mxu0 %v3646_v60  ;;  %1803 = vmatprep.subr.bf16.mxu1 %v3649_v61  ;;  %v3737_v60 = vld [vmem:[#allocation7 + $0x80] ss:$8 sps:$4 sm:$0xff]   ;;  %v3742_v61 = vld [vmem:[#allocation7 + $0x94] ss:$8 sps:$4 sm:$0xff]  }
 0x147   :  { %1640 = vmatpush1.bf16.msra.mxu0 %v3644_v62  ;;  %1804 = vmatpush1.bf16.msra.mxu1 %v3647_v63  ;;  %v3740_v62 = vld [vmem:[#allocation7 + $0x90] ss:$8 sps:$4 sm:$0xff]   ;;  %v3745_v63 = vld [vmem:[#allocation7 + $0xa4] ss:$8 sps:$4 sm:$0xff]  }
 0x148   :  { %1641 = vmatprep.subr.bf16.mxu0 %v3652_v0  ;;  %1805 = vmatprep.subr.bf16.mxu1 %v3655_v1  ;;  %v3743_v0 = vld [vmem:[#allocation7 + $0xa0] ss:$8 sps:$4 sm:$0xff]   ;;  %v3748_v1 = vld [vmem:[#allocation7 + $0xb4] ss:$8 sps:$4 sm:$0xff]  }
 0x14b   :  { %1642 = vmatpush1.bf16.msra.mxu0 %v3650_v2  ;;  %1806 = vmatpush1.bf16.msra.mxu1 %v3653_v3  ;;  %v3746_v2 = vld [vmem:[#allocation7 + $0xb0] ss:$8 sps:$4 sm:$0xff]   ;;  %v3751_v3 = vld [vmem:[#allocation7 + $0xc4] ss:$8 sps:$4 sm:$0xff]  }
 0x14c   :  { %1643 = vmatprep.subr.bf16.mxu0 %v3658_v4  ;;  %1807 = vmatprep.subr.bf16.mxu1 %v3661_v5  ;;  %v3749_v4 = vld [vmem:[#allocation7 + $0xc0] ss:$8 sps:$4 sm:$0xff]   ;;  %v3754_v5 = vld [vmem:[#allocation7 + $0xd4] ss:$8 sps:$4 sm:$0xff]  }
 0x14f   :  { %1644 = vmatpush1.bf16.msra.mxu0 %v3656_v6  ;;  %1808 = vmatpush1.bf16.msra.mxu1 %v3659_v7  ;;  %v3752_v6 = vld [vmem:[#allocation7 + $0xd0] ss:$8 sps:$4 sm:$0xff]   ;;  %v3757_v7 = vld [vmem:[#allocation7 + $0xe4] ss:$8 sps:$4 sm:$0xff]  }
 0x150   :  { %1654 = vmatprep.subr.bf16.mxu0 %v3666_v8  ;;  %1818 = vmatprep.subr.bf16.mxu1 %v3669_v9  ;;  %v3755_v8 = vld [vmem:[#allocation7 + $0xe0] ss:$8 sps:$4 sm:$0xff]   ;;  %v3760_v9 = vld [vmem:[#allocation7 + $0xf4] ss:$8 sps:$4 sm:$0xff]  }
 0x152   :  { %1646 = vmatmul.mubr.bf16.vlgmr.msra.gmra.mrb[0].mxu0 %v2878_v13  ;;  %1810 = vmatmul.mubr.bf16.vlgmr.msra.gmra.mrb[0].mxu1 %v2878_v13  ;;  %v3809_v13 = vld [vmem:[#allocation8 + $0x40] sm:$0xff]  }
 0x153   :  { %1655 = vmatpush1.bf16.msra.mxu0 %v3664_v10  ;;  %1819 = vmatpush1.bf16.msra.mxu1 %v3667_v12  ;;  %v3758_v10 = vld [vmem:[#allocation7 + $0xf0] ss:$8 sps:$4 sm:$0xff]   ;;  %v3763_v12 = vld [vmem:[#allocation7 + $0x104] ss:$8 sps:$4 sm:$0xff]  }
 0x154   :  { %1656 = vmatprep.subr.bf16.mxu0 %v3672_v14  ;;  %1820 = vmatprep.subr.bf16.mxu1 %v3675_v15  ;;  %v3810_v14 = vld [vmem:[#allocation8] sm:$0xff]   ;;  %v3811_v15 = vld [vmem:[#allocation8 + $0x48] sm:$0xff]  }
 0x155   :  { %1686 = vmatprep.mubr.bf16.mxu0 %v4077_v22  ;;  %1850 = vmatprep.mubr.bf16.mxu1 %v4077_v22  ;;  %v3818_v22 = vld [vmem:[#allocation8 + $0x20] sm:$0xff]  }
 0x157   :  { %1657 = vmatpush1.bf16.msra.mxu0 %v3670_v16  ;;  %1821 = vmatpush1.bf16.msra.mxu1 %v3673_v17  ;;  %v3812_v16 = vld [vmem:[#allocation8 + $0x8] sm:$0xff]   ;;  %v3813_v17 = vld [vmem:[#allocation8 + $0x50] sm:$0xff]  }
 0x158   :  { %1658 = vmatprep.subr.bf16.mxu0 %v3678_v18  ;;  %1822 = vmatprep.subr.bf16.mxu1 %v3681_v19  ;;  %v3814_v18 = vld [vmem:[#allocation8 + $0x10] sm:$0xff]   ;;  %v3815_v19 = vld [vmem:[#allocation8 + $0x58] sm:$0xff]  }
 0x15b   :  { %1659 = vmatpush1.bf16.msra.mxu0 %v3676_v20  ;;  %1823 = vmatpush1.bf16.msra.mxu1 %v3679_v21  ;;  %v3816_v20 = vld [vmem:[#allocation8 + $0x18] sm:$0xff]   ;;  %v3817_v21 = vld [vmem:[#allocation8 + $0x60] sm:$0xff]  }
 0x15c   :  { %1660 = vmatprep.subr.bf16.mxu0 %v3684_v11  ;;  %1824 = vmatprep.subr.bf16.mxu1 %v3687_v23  ;;  %v3819_v11 = vld [vmem:[#allocation8 + $0x68] sm:$0xff]  }
 0x15d   :  { %v3820_v23 = vld [vmem:[#allocation8 + $0x28] sm:$0xff]  }
 0x15f   :  { %1661 = vmatpush1.bf16.msra.mxu0 %v3682_v24  ;;  %1825 = vmatpush1.bf16.msra.mxu1 %v3685_v25  ;;  %v366_v24 = vlaneseq }
 0x160   :  { %1662 = vmatprep.subr.bf16.mxu0 %v3690_v26  ;;  %1826 = vmatprep.subr.bf16.mxu1 %v3693_v27  ;;  %v4250_v27 = vld [vmem:[#allocation14] ss:$8 sm:$0xf] }
 0x161   :  { %v4247_v25 = vshrl.u32 %v366_v24, 7 }
 0x163   :  { %1663 = vmatpush1.bf16.msra.mxu0 %v3688_v28  ;;  %1827 = vmatpush1.bf16.msra.mxu1 %v3691_v29  ;;  %v368_v26 = vsub.s32 0, %v4247_v25  ;;  %v372_v28 = vsub.s32 1, %v4247_v25  ;;  %v380_v29 = vsub.s32 3, %v4247_v25 }
 0x164   :  { %1664 = vmatprep.subr.bf16.mxu0 %v3696_v30  ;;  %1828 = vmatprep.subr.bf16.mxu1 %v3699_v31 }
 0x165   :  { %v369_v30 = vrot.slane %v4250_v27, %v368_v26  ;;  %v373_v31 = vrot.slane %v4250_v27, %v372_v28 }
 0x167   :  { %1665 = vmatpush1.bf16.msra.mxu0 %v3694_v32  ;;  %1829 = vmatpush1.bf16.msra.mxu1 %v3697_v33  ;;  %v381_v32 = vrot.slane %v4250_v27, %v380_v29  ;;  %v3824_v29 = vld [vmem:[#allocation8 + $0x38] sm:$0xff]  }
 0x168   :  { %1666 = vmatprep.subr.bf16.mxu0 %v3702_v34  ;;  %1830 = vmatprep.subr.bf16.mxu1 %v3705_v35 }
 0x16b   :  { %1667 = vmatpush1.bf16.msra.mxu0 %v3700_v36  ;;  %1831 = vmatpush1.bf16.msra.mxu1 %v3703_v37 }
 0x16c   :  { %1668 = vmatprep.subr.bf16.mxu0 %v3708_v38  ;;  %1832 = vmatprep.subr.bf16.mxu1 %v3711_v39 }
 0x16f   :  { %1669 = vmatpush1.bf16.msra.mxu0 %v3706_v40  ;;  %1833 = vmatpush1.bf16.msra.mxu1 %v3709_v41 }
 0x170   :  { %2264 = vmatprep.subr.bf16.mxu0 %v3715_v42  ;;  %3209 = vmatprep.subr.bf16.mxu1 %v3809_v13  ;;  %v3802_v13 = vld [vmem:[#allocation7 + $0x1d4] ss:$8 sps:$4 sm:$0xff]  }
 0x172   :  { %1687 = vmatmul.mubr.bf16.vlgmr.msra.gmra.mrb[0].mxu0 %v3712_v43  ;;  %1851 = vmatmul.mubr.bf16.vlgmr.msra.gmra.mrb[0].mxu1 %v3712_v43 }
 0x173   :  { %2265 = vmatpush1.bf16.msra.mxu0 %v3713_v44  ;;  %3210 = vmatpush3.bf16.msra.mxu1 %v3810_v14  ;;  %v3800_v14 = vld [vmem:[#allocation7 + $0x1d0] ss:$8 sps:$4 sm:$0xff]  }
 0x174   :  { %2266 = vmatprep.subr.bf16.mxu0 %v3718_v45  ;;  %3211 = vmatprep.subr.bf16.mxu1 %v3811_v15 }
 0x177   :  { %2267 = vmatpush1.bf16.msra.mxu0 %v3716_v46  ;;  %3212 = vmatpush3.bf16.msra.mxu1 %v3812_v16  ;;  %v3805_v16 = vld [vmem:[#allocation7 + $0x1e4] ss:$8 sps:$4 sm:$0xff]  }
 0x178   :  { %2268 = vmatprep.subr.bf16.mxu0 %v3721_v47  ;;  %3213 = vmatprep.subr.bf16.mxu1 %v3813_v17  ;;  %v3803_v17 = vld [vmem:[#allocation7 + $0x1e0] ss:$8 sps:$4 sm:$0xff]  }
 0x17b   :  { %2269 = vmatpush1.bf16.msra.mxu0 %v3719_v48  ;;  %3214 = vmatpush3.bf16.msra.mxu1 %v3814_v18  ;;  %v3761_v48 = vld [vmem:[#allocation7 + $0x100] ss:$8 sps:$4 sm:$0xff]  }
 0x17c   :  { %2270 = vmatprep.subr.bf16.mxu0 %v3724_v49  ;;  %3215 = vmatprep.subr.bf16.mxu1 %v3815_v19  ;;  %v3808_v19 = vld [vmem:[#allocation7 + $0x1f4] ss:$8 sps:$4 sm:$0xff]  }
 0x17f   :  { %2271 = vmatpush1.bf16.msra.mxu0 %v3722_v50  ;;  %3216 = vmatpush3.bf16.msra.mxu1 %v3816_v20  ;;  %v3766_v50 = vld [vmem:[#allocation7 + $0x114] ss:$8 sps:$4 sm:$0xff]   ;;  %v3806_v20 = vld [vmem:[#allocation7 + $0x1f0] ss:$8 sps:$4 sm:$0xff]  }
 0x180   :  { %2272 = vmatprep.subr.bf16.mxu0 %v3727_v51  ;;  %3217 = vmatprep.subr.bf16.mxu1 %v3817_v21 }
 0x183   :  { %2273 = vmatpush1.bf16.msra.mxu0 %v3725_v52  ;;  %3218 = vmatpush3.bf16.msra.mxu1 %v3818_v22  ;;  %v3764_v52 = vld [vmem:[#allocation7 + $0x110] ss:$8 sps:$4 sm:$0xff]  }
 0x184   :  { %2274 = vmatprep.subr.bf16.mxu0 %v3730_v53  ;;  %3219 = vmatprep.subr.bf16.mxu1 %v3819_v11  ;;  %v3769_v53 = vld [vmem:[#allocation7 + $0x124] ss:$8 sps:$4 sm:$0xff]   ;;  %v3821_v11 = vld [vmem:[#allocation8 + $0x70] sm:$0xff]  }
 0x187   :  { %2275 = vmatpush1.bf16.msra.mxu0 %v3728_v54  ;;  %3220 = vmatpush3.bf16.msra.mxu1 %v3820_v23  ;;  %v3767_v54 = vld [vmem:[#allocation7 + $0x120] ss:$8 sps:$4 sm:$0xff]   ;;  %v3822_v23 = vld [vmem:[#allocation8 + $0x30] sm:$0xff]  }
 0x188   :  { %2276 = vmatprep.subr.bf16.mxu0 %v3733_v55  ;;  %v3772_v55 = vld [vmem:[#allocation7 + $0x134] ss:$8 sps:$4 sm:$0xff]   ;;  %3221 = vmatprep.subr.bf16.mxu1 %v3821_v11 }
 0x18b   :  { %2277 = vmatpush1.bf16.msra.mxu0 %v3731_v56  ;;  %v3770_v56 = vld [vmem:[#allocation7 + $0x130] ss:$8 sps:$4 sm:$0xff]   ;;  %3222 = vmatpush3.bf16.msra.mxu1 %v3822_v23 }
 0x18c   :  { %2278 = vmatprep.subr.bf16.mxu0 %v3736_v57  ;;  %v3775_v57 = vld [vmem:[#allocation7 + $0x144] ss:$8 sps:$4 sm:$0xff]  }
 0x18f   :  { %2279 = vmatpush1.bf16.msra.mxu0 %v3734_v58  ;;  %v3773_v58 = vld [vmem:[#allocation7 + $0x140] ss:$8 sps:$4 sm:$0xff]  }
 0x190   :  { %2280 = vmatprep.subr.bf16.mxu0 %v3739_v59  ;;  %v3778_v59 = vld [vmem:[#allocation7 + $0x154] ss:$8 sps:$4 sm:$0xff]  }
 0x193   :  { %2281 = vmatpush1.bf16.msra.mxu0 %v3737_v60  ;;  %v3776_v60 = vld [vmem:[#allocation7 + $0x150] ss:$8 sps:$4 sm:$0xff]  }
 0x194   :  { %2282 = vmatprep.subr.bf16.mxu0 %v3742_v61  ;;  %v3781_v61 = vld [vmem:[#allocation7 + $0x164] ss:$8 sps:$4 sm:$0xff]  }
 0x197   :  { %2283 = vmatpush1.bf16.msra.mxu0 %v3740_v62  ;;  %v3779_v62 = vld [vmem:[#allocation7 + $0x160] ss:$8 sps:$4 sm:$0xff]  }
 0x198   :  { %2284 = vmatprep.subr.bf16.mxu0 %v3745_v63  ;;  %v3784_v63 = vld [vmem:[#allocation7 + $0x174] ss:$8 sps:$4 sm:$0xff]  }
 0x19b   :  { %2285 = vmatpush1.bf16.msra.mxu0 %v3743_v0  ;;  %v3782_v0 = vld [vmem:[#allocation7 + $0x170] ss:$8 sps:$4 sm:$0xff]  }
 0x19c   :  { %2286 = vmatprep.subr.bf16.mxu0 %v3748_v1  ;;  %v3787_v1 = vld [vmem:[#allocation7 + $0x184] ss:$8 sps:$4 sm:$0xff]  }
 0x19f   :  { %2287 = vmatpush1.bf16.msra.mxu0 %v3746_v2  ;;  %v3785_v2 = vld [vmem:[#allocation7 + $0x180] ss:$8 sps:$4 sm:$0xff]  }
 0x1a0   :  { %2288 = vmatprep.subr.bf16.mxu0 %v3751_v3  ;;  %v3790_v3 = vld [vmem:[#allocation7 + $0x194] ss:$8 sps:$4 sm:$0xff]  }
 0x1a3   :  { %2289 = vmatpush1.bf16.msra.mxu0 %v3749_v4  ;;  %v3788_v4 = vld [vmem:[#allocation7 + $0x190] ss:$8 sps:$4 sm:$0xff]  }
 0x1a4   :  { %2290 = vmatprep.subr.bf16.mxu0 %v3754_v5  ;;  %v3793_v5 = vld [vmem:[#allocation7 + $0x1a4] ss:$8 sps:$4 sm:$0xff]  }
 0x1a7   :  { %2291 = vmatpush1.bf16.msra.mxu0 %v3752_v6  ;;  %v3791_v6 = vld [vmem:[#allocation7 + $0x1a0] ss:$8 sps:$4 sm:$0xff]  }
 0x1a8   :  { %2292 = vmatprep.subr.bf16.mxu0 %v3757_v7  ;;  %v3796_v7 = vld [vmem:[#allocation7 + $0x1b4] ss:$8 sps:$4 sm:$0xff]  }
 0x1ab   :  { %2293 = vmatpush1.bf16.msra.mxu0 %v3755_v8  ;;  %v3794_v8 = vld [vmem:[#allocation7 + $0x1b0] ss:$8 sps:$4 sm:$0xff]  }
 0x1ac   :  { %2294 = vmatprep.subr.bf16.mxu0 %v3760_v9  ;;  %v3799_v9 = vld [vmem:[#allocation7 + $0x1c4] ss:$8 sps:$4 sm:$0xff]  }
 0x1af   :  { %2295 = vmatpush1.bf16.msra.mxu0 %v3758_v10  ;;  %v3797_v10 = vld [vmem:[#allocation7 + $0x1c0] ss:$8 sps:$4 sm:$0xff]  }
 0x1b0   :  { %2305 = vmatprep.subr.bf16.mxu0 %v3763_v12  ;;  %v376_v12 = vsub.s32 2, %v4247_v25  ;;  %v3827_v25 = vld [vmem:[#allocation10 + $0x10] sm:$0xff]  }
 0x1b2   :  { %v377_v15 = vrot.slane %v4250_v27, %v376_v12  ;;  %v3823_v27 = vld [vmem:[#allocation8 + $0x78] sm:$0xff]   ;;  %v3842_v12 = vld [vmem:[#allocation13 + $0x8] sm:$0xff]  }
 0x1b3   :  { %3223 = vmatprep.subr.bf16.mxu1 %v3823_v27 }
 0x1b4   :  { %3224 = vmatpush3.bf16.msra.mxu1 %v3824_v29 }
 0x245   :  { %v1688_v33 = vpop.f32.mrb[0].mxu0  ;;  %v4261_v34 = vpop.f32.mrb[0].mxu1 }
 0x246   :  { %v3318_v35 = vadd.f32 %v1688_v33, %v369_v30  ;;  %v1690_v36 = vpop.f32.mrb[1].mxu0  ;;  %v1854_v37 = vpop.f32.mrb[1].mxu1  ;;  %v3320_v18 = vadd.f32 %v4261_v34, %v377_v15  ;;  %v4078_v30 = vmov 0.0   ;;  %v3845_v15 = vld [vmem:[#allocation13 + $0x20] sm:$0xff]  }
 0x247   :  { %v3319_v38 = vadd.f32 %v1690_v36, %v373_v31  ;;  %v3321_v39 = vadd.f32 %v1854_v37, %v381_v32  ;;  %v1692_v40 = vpop.f32.mrb[2].mxu0  ;;  %v1856_v41 = vpop.f32.mrb[2].mxu1  ;;  %3258 = vmatprep.subr.bf16.mxu1 %v4078_v30  ;;  %v1932_v31 = vld [vmem:[#allocation14 + $0x1] ss:$8 sm:$0x3] }
 0x248   :  { %v1859_v42 = vmax.f32 %v3318_v35, 0.0  ;;  %v1693_v43 = vpop.f32.mrb[3].mxu0  ;;  %v1857_v44 = vpop.f32.mrb[3].mxu1  ;;  %v1861_v21 = vmax.f32 %v3320_v18, 0.0  ;;  %v1937_v32 = vrot.slane %v1932_v31, %v368_v26  ;;  %v1941_v33 = vrot.slane %v1932_v31, %v372_v28  ;;  %v3828_v26 = vld [vmem:[#allocation10 + $0x18] sm:$0xff]   ;;  %v3829_v28 = vld [vmem:[#allocation10 + $0x20] sm:$0xff]  }
 0x249   :  { %v1860_v45 = vmax.f32 %v3319_v38, 0.0  ;;  %v1862_v46 = vmax.f32 %v3321_v39, 0.0  ;;  %v3825_v43 = vld [vmem:[#allocation10] sm:$0xff]   ;;  %v3848_v18 = vld [vmem:[#allocation13 + $0x38] sm:$0xff]   ;;  %v2841_v31 = vand.u32 127, %v366_v24 }
 0x24a   :  { %v1863_v49 = vpack.c.bf16 %v1859_v42, %v1859_v42  ;;  %v1865_v22 = vpack.c.bf16 %v1861_v21, %v1861_v21 }
 0x24b   :  { %v1864_v47 = vpack.c.bf16 %v1860_v45, %v1860_v45  ;;  %v1866_v51 = vpack.c.bf16 %v1862_v46, %v1862_v46  ;;  %v3826_v45 = vld [vmem:[#allocation10 + $0x8] sm:$0xff]   ;;  %vm2842_vm1 = vcmp.lt.s32.totalorder %v2841_v31, 10 }
 0x24c   :  { %v3830_v46 = vld [vmem:[#allocation10 + $0x28] sm:$0xff]  }
 0x24d   :  { %2296 = vmatprep.mubr.bf16.mxu0 %v1864_v47  ;;  %v3831_v47 = vld [vmem:[#allocation10 + $0x30] sm:$0xff]  }
 0x24e   :  { %2297 = vmatmul.mubr.bf16.vlgmr.msra.gmra.mrb[4].mxu0 %v1863_v49 }
 0x24f   :  { %2306 = vmatpush1.bf16.msra.mxu0 %v3761_v48  ;;  %2337 = vmatprep.mubr.bf16.mxu0 %v1866_v51  ;;  %v3832_v48 = vld [vmem:[#allocation10 + $0x38] sm:$0xff]  }
 0x250   :  { %2307 = vmatprep.subr.bf16.mxu0 %v3766_v50  ;;  %v2382_v50 = vld [vmem:[#allocation14 + $0x2] ss:$0 sm:$0xff] }
 0x253   :  { %2308 = vmatpush1.bf16.msra.mxu0 %v3764_v52 }
 0x254   :  { %2309 = vmatprep.subr.bf16.mxu0 %v3769_v53 }
 0x257   :  { %2310 = vmatpush1.bf16.msra.mxu0 %v3767_v54 }
 0x258   :  { %2311 = vmatprep.subr.bf16.mxu0 %v3772_v55 }
 0x25b   :  { %2312 = vmatpush1.bf16.msra.mxu0 %v3770_v56 }
 0x25c   :  { %2313 = vmatprep.subr.bf16.mxu0 %v3775_v57  ;;  %v3833_v57 = vld [vmem:[#allocation11] sm:$0xff]  }
 0x25f   :  { %2314 = vmatpush1.bf16.msra.mxu0 %v3773_v58 }
 0x260   :  { %2315 = vmatprep.subr.bf16.mxu0 %v3778_v59  ;;  %v3834_v59 = vld [vmem:[#allocation11 + $0x8] sm:$0xff]  }
 0x263   :  { %2316 = vmatpush1.bf16.msra.mxu0 %v3776_v60  ;;  %v3835_v60 = vld [vmem:[#allocation11 + $0x10] sm:$0xff]  }
 0x264   :  { %2317 = vmatprep.subr.bf16.mxu0 %v3781_v61  ;;  %v3836_v61 = vld [vmem:[#allocation11 + $0x18] sm:$0xff]  }
 0x267   :  { %2318 = vmatpush1.bf16.msra.mxu0 %v3779_v62  ;;  %v3837_v62 = vld [vmem:[#allocation11 + $0x20] sm:$0xff]  }
 0x268   :  { %2319 = vmatprep.subr.bf16.mxu0 %v3784_v63  ;;  %v3838_v63 = vld [vmem:[#allocation11 + $0x28] sm:$0xff]  }
 0x26b   :  { %2320 = vmatpush1.bf16.msra.mxu0 %v3782_v0  ;;  %v3839_v0 = vld [vmem:[#allocation11 + $0x30] sm:$0xff]  }
 0x26c   :  { %2321 = vmatprep.subr.bf16.mxu0 %v3787_v1  ;;  %v3840_v1 = vld [vmem:[#allocation11 + $0x38] sm:$0xff]  }
 0x26f   :  { %2322 = vmatpush1.bf16.msra.mxu0 %v3785_v2  ;;  %v2537_v2 = vld [vmem:[#allocation14 + $0x3] ss:$0 sm:$0xff] }
 0x270   :  { %2323 = vmatprep.subr.bf16.mxu0 %v3790_v3 }
 0x273   :  { %2324 = vmatpush1.bf16.msra.mxu0 %v3788_v4 }
 0x274   :  { %2325 = vmatprep.subr.bf16.mxu0 %v3793_v5 }
 0x277   :  { %2326 = vmatpush1.bf16.msra.mxu0 %v3791_v6 }
 0x278   :  { %2327 = vmatprep.subr.bf16.mxu0 %v3796_v7 }
 0x27b   :  { %2328 = vmatpush1.bf16.msra.mxu0 %v3794_v8 }
 0x27c   :  { %2329 = vmatprep.subr.bf16.mxu0 %v3799_v9  ;;  %v3841_v9 = vld [vmem:[#allocation13] sm:$0xff]  }
 0x27f   :  { %2330 = vmatpush1.bf16.msra.mxu0 %v3797_v10 }
 0x280   :  { %2331 = vmatprep.subr.bf16.mxu0 %v3802_v13  ;;  %v3843_v13 = vld [vmem:[#allocation13 + $0x10] sm:$0xff]  }
 0x283   :  { %2332 = vmatpush1.bf16.msra.mxu0 %v3800_v14  ;;  %v3844_v14 = vld [vmem:[#allocation13 + $0x18] sm:$0xff]  }
 0x284   :  { %2333 = vmatprep.subr.bf16.mxu0 %v3805_v16  ;;  %v3846_v16 = vld [vmem:[#allocation13 + $0x28] sm:$0xff]  }
 0x287   :  { %2334 = vmatpush1.bf16.msra.mxu0 %v3803_v17  ;;  %v3847_v17 = vld [vmem:[#allocation13 + $0x30] sm:$0xff]  }
 0x288   :  { %2335 = vmatprep.subr.bf16.mxu0 %v3808_v19  ;;  %v2644_v19 = vld [vmem:[#allocation14 + $0x4] ss:$0 sm:$0xff] }
 0x28b   :  { %2336 = vmatpush1.bf16.msra.mxu0 %v3806_v20 }
 0x28e   :  { %2338 = vmatmul.mubr.bf16.vlgmr.msra.gmra.mrb[4].mxu0 %v1865_v22 }
 0x361   :  { %v2339_v34 = vpop.f32.mrb[4].mxu0 }
 0x362   :  { %v3322_v35 = vadd.f32 %v2339_v34, %v1937_v32  ;;  %v2341_v36 = vpop.f32.mrb[5].mxu0  ;;  %v2751_v32 = vld [vmem:[#allocation14 + $0x5] ss:$0 sm:$0xff] }
 0x363   :  { %v3323_v37 = vadd.f32 %v2341_v36, %v1941_v33  ;;  %v2343_v38 = vpop.f32.mrb[6].mxu0 }
 0x364   :  { %v2346_v39 = vmax.f32 %v3322_v35, 0.0  ;;  %v2344_v40 = vpop.f32.mrb[7].mxu0 }
 0x365   :  { %v2347_v41 = vmax.f32 %v3323_v37, 0.0 }
 0x366   :  { %v2348_v44 = vpack.c.bf16 %v2346_v39, %v2346_v39 }
 0x367   :  { %v2349_v42 = vpack.c.bf16 %v2347_v41, %v2347_v41 }
 0x369   :  { %2511 = vmatprep.mubr.bf16.mxu1 %v2349_v42 }
 0x36a   :  { %2512 = vmatmul.mubr.bf16.vlgmr.msra.gmra.mrb[4].mxu1 %v2348_v44 }
 0x36b   :  { %3259 = vmatpush3.bf16.msra.mxu1 %v3825_v43  ;;  %3274 = vmatprep.mubr.msk.bf16.mxu1 %vm4079_vm0, %v4078_v30 }
 0x36c   :  { %3260 = vmatprep.subr.bf16.mxu1 %v4078_v30 }
 0x36f   :  { %3261 = vmatpush3.bf16.msra.mxu1 %v3826_v45 }
 0x370   :  { %3262 = vmatprep.subr.bf16.mxu1 %v4078_v30 }
 0x373   :  { %3263 = vmatpush3.bf16.msra.mxu1 %v3827_v25 }
 0x374   :  { %3264 = vmatprep.subr.bf16.mxu1 %v4078_v30 }
 0x377   :  { %3265 = vmatpush3.bf16.msra.mxu1 %v3828_v26 }
 0x378   :  { %3266 = vmatprep.subr.bf16.mxu1 %v4078_v30 }
 0x37b   :  { %3267 = vmatpush3.bf16.msra.mxu1 %v3829_v28 }
 0x37c   :  { %3268 = vmatprep.subr.bf16.mxu1 %v4078_v30 }
 0x37f   :  { %3269 = vmatpush3.bf16.msra.mxu1 %v3830_v46 }
 0x380   :  { %3270 = vmatprep.subr.bf16.mxu1 %v4078_v30 }
 0x383   :  { %3271 = vmatpush3.bf16.msra.mxu1 %v3831_v47 }
 0x384   :  { %3272 = vmatprep.subr.bf16.mxu1 %v4078_v30 }
 0x387   :  { %3273 = vmatpush3.bf16.msra.mxu1 %v3832_v48 }
 0x388   :  { %3278 = vmatprep.subr.bf16.mxu1 %v4078_v30 }
 0x43d   :  { %v3225_v49 = vpop.f32.mrb[4].mxu1 }
 0x43e   :  { %v3226_v51 = vpop.f32.mrb[5].mxu1 }
 0x43f   :  { %v3227_v52 = vadd.f32 %v3226_v51, %v3225_v49  ;;  %v3228_v53 = vpop.f32.mrb[6].mxu1 }
 0x440   :  { %v3229_v54 = vpop.f32.mrb[7].mxu1 }
 0x441   :  { %v2514_v55 = vadd.f32 %v3227_v52, %v2382_v50 }
 0x443   :  { %v2519_v56 = vmax.f32 %v2514_v55, 0.0 }
 0x445   :  { %v2520_v58 = vpack.c.bf16 %v2519_v56, %v2519_v56 }
 0x447   :  { %3275 = vmatmul.mubr.bf16.vlgmr.msra.gmra.mrb[8].mxu1 %v2520_v58 }
 0x448   :  { %3279 = vmatpush3.bf16.msra.mxu1 %v3833_v57  ;;  %3294 = vmatprep.mubr.msk.bf16.mxu1 %vm4079_vm0, %v4078_v30 }
 0x449   :  { %3280 = vmatprep.subr.bf16.mxu1 %v4078_v30 }
 0x44c   :  { %3281 = vmatpush3.bf16.msra.mxu1 %v3834_v59 }
 0x44d   :  { %3282 = vmatprep.subr.bf16.mxu1 %v4078_v30 }
 0x450   :  { %3283 = vmatpush3.bf16.msra.mxu1 %v3835_v60 }
 0x451   :  { %3284 = vmatprep.subr.bf16.mxu1 %v4078_v30 }
 0x454   :  { %3285 = vmatpush3.bf16.msra.mxu1 %v3836_v61 }
 0x455   :  { %3286 = vmatprep.subr.bf16.mxu1 %v4078_v30 }
 0x458   :  { %3287 = vmatpush3.bf16.msra.mxu1 %v3837_v62 }
 0x459   :  { %3288 = vmatprep.subr.bf16.mxu1 %v4078_v30 }
 0x45c   :  { %3289 = vmatpush3.bf16.msra.mxu1 %v3838_v63 }
 0x45d   :  { %3290 = vmatprep.subr.bf16.mxu1 %v4078_v30 }
 0x460   :  { %3291 = vmatpush3.bf16.msra.mxu1 %v3839_v0 }
 0x461   :  { %3292 = vmatprep.subr.bf16.mxu1 %v4078_v30 }
 0x464   :  { %3293 = vmatpush3.bf16.msra.mxu1 %v3840_v1 }
 0x465   :  { %3298 = vmatprep.subr.bf16.mxu1 %v4078_v30 }
 0x51a   :  { %v2620_v3 = vpop.f32.mrb[8].mxu1 }
 0x51b   :  { %v2621_v4 = vadd.f32 %v2620_v3, %v2537_v2  ;;  %v3276_v5 = vpop.f32.mrb[9].mxu1 }
 0x51c   :  { %v2623_v6 = vpop.f32.mrb[10].mxu1 }
 0x51d   :  { %v2626_v7 = vmax.f32 %v2621_v4, 0.0  ;;  %v3277_v8 = vpop.f32.mrb[11].mxu1 }
 0x51f   :  { %v2627_v10 = vpack.c.bf16 %v2626_v7, %v2626_v7 }
 0x521   :  { %3295 = vmatmul.mubr.bf16.vlgmr.msra.gmra.mrb[12].mxu1 %v2627_v10 }
 0x522   :  { %3299 = vmatpush3.bf16.msra.mxu1 %v3841_v9  ;;  %3314 = vmatprep.mubr.msk.bf16.mxu1 %vm4079_vm0, %v4078_v30 }
 0x523   :  { %3300 = vmatprep.subr.bf16.mxu1 %v4078_v30 }
 0x526   :  { %3301 = vmatpush3.bf16.msra.mxu1 %v3842_v12 }
 0x527   :  { %3302 = vmatprep.subr.bf16.mxu1 %v4078_v30 }
 0x52a   :  { %3303 = vmatpush3.bf16.msra.mxu1 %v3843_v13 }
 0x52b   :  { %3304 = vmatprep.subr.bf16.mxu1 %v4078_v30 }
 0x52e   :  { %3305 = vmatpush3.bf16.msra.mxu1 %v3844_v14 }
 0x52f   :  { %3306 = vmatprep.subr.bf16.mxu1 %v4078_v30 }
 0x532   :  { %3307 = vmatpush3.bf16.msra.mxu1 %v3845_v15 }
 0x533   :  { %3308 = vmatprep.subr.bf16.mxu1 %v4078_v30 }
 0x536   :  { %3309 = vmatpush3.bf16.msra.mxu1 %v3846_v16 }
 0x537   :  { %3310 = vmatprep.subr.bf16.mxu1 %v4078_v30 }
 0x53a   :  { %3311 = vmatpush3.bf16.msra.mxu1 %v3847_v17 }
 0x53b   :  { %3312 = vmatprep.subr.bf16.mxu1 %v4078_v30 }
 0x53e   :  { %3313 = vmatpush3.bf16.msra.mxu1 %v3848_v18 }
 0x5f4   :  { %v2727_v20 = vpop.f32.mrb[12].mxu1 }
 0x5f5   :  { %v2728_v21 = vadd.f32 %v2727_v20, %v2644_v19  ;;  %v3296_v22 = vpop.f32.mrb[13].mxu1 }
 0x5f6   :  { %v2730_v11 = vpop.f32.mrb[14].mxu1 }
 0x5f7   :  { %v2733_v23 = vmax.f32 %v2728_v21, 0.0  ;;  %v3297_v27 = vpop.f32.mrb[15].mxu1 }
 0x5f9   :  { %v2734_v29 = vpack.c.bf16 %v2733_v23, %v2733_v23 }
 0x5fb   :  { %3315 = vmatmul.mubr.bf16.vlgmr.msra.gmra.mrb[16].mxu1 %v2734_v29 }
 0x6ce   :  { %v2834_v33 = vpop.f32.mrb[16].mxu1 }
 0x6cf   :  { %v2835_v34 = vadd.f32 %v2834_v33, %v2751_v32  ;;  %v3316_v35 = vpop.f32.mrb[17].mxu1 }
 0x6d0   :  { %v2837_v36 = vpop.f32.mrb[18].mxu1 }
 0x6d1   :  { %v3317_v30 = vpop.f32.mrb[19].mxu1  ;;  %v2843_v37 = vsel %vm2842_vm1, %v2835_v34, -1e+30 }
 0x6d2   :  { %2844 = vmax.xlane.f32.xlu0 %v2843_v37 }
 0x75f   :  { %v2845_v38 = vpop.xlane.xlu0 %2844 }
 0x760   :  { %v2846_v39 = vsub.f32 %v2843_v37, %v2845_v38 }
 0x762   :  { %v2847_v40 = vmul.f32 1.442695, %v2846_v39 }
 0x764   :  { %3849 = vpow2.f32 %v2847_v40 }
 0x76e   :  { %v3850_v41 = vpop.eup %3849 }
 0x76f   :  { %2849 = vadd.xlane.f32.xlu0 %v3850_v41 }
 0x7fc   :  { %v2850_v42 = vpop.xlane.xlu0 %2849 }
 0x7fd   :  { %3851 = vlog2.f32 %v2850_v42 }
 0x807   :  { %v3852_v43 = vpop.eup %3851 }
 0x808   :  { %v2852_v24 = vmul.f32 0.6931472, %v3852_v43 }
 0x80a   :  { %v2853_v44 = vsub.f32 %v2846_v39, %v2852_v24 }
 0x80c   :  { %2854 = vst [vmem:[#allocation16] sm:$0xff] %v2853_v44 }
 0x80d   :  { %4040 = shalt.err (!%p4037_p12)
}
 0x80e   :  { %s4041_s2 = scalar_lea.hbm %s4321_s8, 128 }
 0x80f   :  { %p4042_p13 = scmp.ne.s32.totalorder %s4321_s8, %s4041_s2  ;;  %p4045_p0 = scmp.lt.u32.totalorder %s4041_s2, %s4321_s8 }
 0x811   :  { %p4047_p1 = pnand %p4045_p0, %p4042_p13 }
 0x813   :  { %4050 = shalt.err (!%p4047_p1)
}
 0x814   :  { %2864 = dma.vmem_to_hbm [thread:$0]  %s2862_s28, 128, %s4321_s8, [#allocation4]  }
 0x815   :  { %4061 = dma.done.wait [#allocation4], 128  }
 0x816   :  { %4062 = vsyncadd [#allocation4], 4294967168 }
 0x817   :  { %2868 = vsyncpa [#allocation3], 1 }
 0x818   :  { %2869 = vsyncpa [#allocation6], 1 }
 0x819   :  { %2870 = vsyncpa [#allocation9], 1 }
 0x81a   :  { %2871 = vsyncpa [#allocation12], 1 }
 0x81b   :  { %2872 = vsyncpa [#allocation15], 1 }
 0x81c   :  { %2873 = vsyncpa [#allocation4], 1 }

</bundles_post_ra>
